<compile_context>
chip_gen: v7x
topology: tpu7x:2x2x1
jax: 0.10.0
libtpu: 0.0.40
codegen_flags: <defaults>
</compile_context>

<pallas_src>
import math
from functools import partial

import jax
import jax.numpy as jnp
from jax.experimental import pallas as pl
from jax.experimental.pallas import tpu as pltpu

F32 = jnp.float32
BN_EPS = 1e-5
LN_EPS = 1e-5
CONV_K = 3
CONV_STRIDE = 2
CVE_MAX_VALUE = 10.0
_HI = jax.lax.Precision.HIGHEST


def _layernorm(v, g, b):
    mu = jnp.mean(v, axis=-1, keepdims=True)
    d = v - mu
    var = jnp.mean(d * d, axis=-1, keepdims=True)
    return d * jax.lax.rsqrt(var + LN_EPS) * g + b


# ============================================================================
# Fused kernel: CVE (step 0) + per-layer [ConvGate + encoder + gate blend]
#               + classifier head (last step).  grid = (num_layers,)
# ============================================================================
def _fused_kernel(x_ref, cvev_ref, cvew2_ref,                       # CVE (resident)
                  gconv_ref, gvecs_ref, glinb_ref,                  # gate  (per-layer)
                  wqkv_ref, bqkv_ref, wo_ref, w1_ref, b1_ref, w2_ref, evecs_ref,  # encoder
                  hwt_ref, hb_ref,                                  # head (resident)
                  logits_ref, gate_ref,                             # outputs
                  h_sc,                                             # VMEM scratch (S, d)
                  *, num_heads, l_out, pool_k):
    layer = pl.program_id(0)
    n_layers = pl.num_programs(0)

    # ---- Stage 0 (first grid step only): ContinuousValueEncoder ------------
    @pl.when(layer == 0)
    def _():
        xv = jnp.minimum(x_ref[...], CVE_MAX_VALUE)                 # clamp(max=10), (S, 1)
        hh = jnp.maximum(xv * cvev_ref[0:1, :] + cvev_ref[1:2, :], 0.0)   # Linear(1,d)+ReLU
        hh = jnp.dot(hh, cvew2_ref[...], preferred_element_type=F32) + cvev_ref[2:3, :]
        h_sc[...] = _layernorm(hh, cvev_ref[3:4, :], cvev_ref[4:5, :])
        # TODO(synk): nn.Dropout(p=0.1) train-mode randomness not reproduced (identity).

    h = h_sc[...]                                                   # residual stream (S, d)
    S, d = h.shape
    dh = d // num_heads
    sm_scale = 1.0 / math.sqrt(dh)

    # ---- ConvGate -----------------------------------------------------------
    # Conv1d(C, C, k=3, stride=2): CONV_K strided-sublane ref loads, each feeding
    # one (l_out, C) x (C, C) matmul (latency-bound; ref-strided pl.ds is the
    # documented TPU idiom).
    y = jnp.zeros((l_out, d), F32)
    for k in range(CONV_K):
        patch = h_sc[pl.ds(k, l_out, stride=CONV_STRIDE), :]
        y = y + jnp.dot(patch, gconv_ref[k], preferred_element_type=F32)
    y = y + gvecs_ref[0:1, :]                                       # conv bias

    # BatchNorm1d (training-mode batch stats, centered two-pass variance) + ReLU.
    mean = jnp.mean(y, axis=0, keepdims=True)
    cent = y - mean
    var = jnp.mean(cent * cent, axis=0, keepdims=True)
    y = jnp.maximum(cent * (gvecs_ref[1:2, :] * jax.lax.rsqrt(var + BN_EPS))
                    + gvecs_ref[2:3, :], 0.0)

    # AvgPool1d(pool_k) then mean over windows == truncated mean over length.
    span = (l_out // pool_k) * pool_k
    feat = jnp.mean(y[0:span, :], axis=0, keepdims=True)            # (1, C)

    # Linear(C -> 1) on the VPU (mul + lane reduce), sigmoid, threshold.
    logit = jnp.sum(feat * gvecs_ref[3:4, :], axis=-1, keepdims=True) + glinb_ref[...]
    prob = 1.0 / (1.0 + jnp.exp(-logit))                            # (1, 1)
    disc = (prob > 0.5).astype(F32)
    # TODO(synk): straight-through-estimator gradient is backward-only; forward matches.
    gate_ref[...] = jnp.concatenate([disc, prob], axis=-1)          # lane-packed (1, 2)

    # ---- TransformerEncoderLayer (post-norm, ReLU FFN) ----------------------
    qkv = jnp.dot(h, wqkv_ref[...], preferred_element_type=F32) + bqkv_ref[...]   # (S, 3d)
    wo = wo_ref[...]                                                 # (d, d)
    attn = jnp.zeros((S, d), F32)
    for hh in range(num_heads):                                      # static head loop
        q = qkv[:, hh * dh:(hh + 1) * dh]
        kk = qkv[:, d + hh * dh:d + (hh + 1) * dh]
        v = qkv[:, 2 * d + hh * dh:2 * d + (hh + 1) * dh]
        s = jnp.dot(q, kk.T, preferred_element_type=F32) * sm_scale
        s = s - jnp.max(s, axis=-1, keepdims=True)
        e = jnp.exp(s)
        pw = e * pl.reciprocal(jnp.sum(e, axis=-1, keepdims=True), approx=True)
        head_out = jnp.dot(pw, v, preferred_element_type=F32)        # (S, dh)
        # Fold the head directly into the output projection (no lane concat).
        attn = attn + jnp.dot(head_out, wo[hh * dh:(hh + 1) * dh, :],
                              preferred_element_type=F32)
    attn = attn + evecs_ref[0:1, :]                                  # out-proj bias

    # TODO(synk): nn.Dropout(p=0.1) inside the encoder layer is identity (eval behavior).
    h1 = _layernorm(h + attn, evecs_ref[1:2, :], evecs_ref[2:3, :])
    ff = jnp.maximum(jnp.dot(h1, w1_ref[...], preferred_element_type=F32) + b1_ref[...], 0.0)
    ff = jnp.dot(ff, w2_ref[...], preferred_element_type=F32) + evecs_ref[3:4, :]
    h2 = _layernorm(h1 + ff, evecs_ref[4:5, :], evecs_ref[5:6, :])

    # `if mask == 1` branch realized as a blend (identical value for mask in {0,1}).
    h_new = disc * h2 + (1.0 - disc) * h
    h_sc[...] = h_new

    # ---- Final stage (last grid step only): max over seq + Linear(num_celltypes)
    @pl.when(layer == n_layers - 1)
    def _():
        # TODO(synk): final nn.Dropout(p=0.2) train-mode randomness not reproduced (identity).
        feat_h = jnp.max(h_new, axis=0, keepdims=True)               # (1, d)
        logits_ref[...] = (jnp.dot(feat_h, hwt_ref[...], preferred_element_type=F32)
                           + hb_ref[...])
        # Note: n_celltypes < 128 -> masked vst; fully internal otherwise, so left as-is.


# ============================================================================
# Wrapper: one pallas_call for the whole forward
# ============================================================================
def model_forward(x, packed, *, pool_size, num_heads):
    B, S = x.shape
    assert B == 1, "Batch size must be 1 (allow_batch=False), as in the PyTorch module."
    d = packed["cve_w2t"].shape[0]
    NL = packed["gconv"].shape[0]
    fc = packed["w1"].shape[-1]
    n_ct = packed["head_wt"].shape[-1]
    l_out = (S - CONV_K) // CONV_STRIDE + 1
    pool_k = math.floor(pool_size / 2 + 0.5)
    assert l_out // pool_k >= 1, "AvgPool1d window larger than conv output"

    x_col = x.reshape(S, 1).astype(F32)          # only per-call layout glue

    const2 = lambda l: (0, 0)                    # resident inputs/outputs
    stack3 = lambda l: (l, 0, 0)                 # per-layer stacked (3-D)
    stack4 = lambda l: (l, 0, 0, 0)              # per-layer stacked (4-D)

    grid_spec = pltpu.PrefetchScalarGridSpec(
        num_scalar_prefetch=0,
        grid=(NL,),
        in_specs=[
            pl.BlockSpec((S, 1), const2),                    # x (raw values)
            pl.BlockSpec((5, d), const2),                    # CVE vecs [w1,b1,b2,ln_g,ln_b]
            pl.BlockSpec((d, d), const2),                    # CVE w2^T
            pl.BlockSpec((None, CONV_K, d, d), stack4),      # gate conv W (K, Cin, Cout)
            pl.BlockSpec((None, 4, d), stack3),              # gate vecs [cb, bn_g, bn_b, lin_w]
            pl.BlockSpec((None, 1, 1), stack3),              # gate lin_b
            pl.BlockSpec((None, d, 3 * d), stack3),          # wqkv^T
            pl.BlockSpec((None, 1, 3 * d), stack3),          # bqkv
            pl.BlockSpec((None, d, d), stack3),              # wo^T
            pl.BlockSpec((None, d, fc), stack3),             # w1^T
            pl.BlockSpec((None, 1, fc), stack3),             # b1
            pl.BlockSpec((None, fc, d), stack3),             # w2^T
            pl.BlockSpec((None, 6, d), stack3),              # enc vecs [bo,ln1g,ln1b,b2,ln2g,ln2b]
            pl.BlockSpec((d, n_ct), const2),                 # head W^T
            pl.BlockSpec((1, n_ct), const2),                 # head b
        ],
        out_specs=(
            pl.BlockSpec((1, n_ct), const2),                 # logits (written at last step)
            pl.BlockSpec((None, 1, 2), stack3),              # per-layer [disc | prob]
        ),
        scratch_shapes=[pltpu.VMEM((S, d), F32)],            # resident residual stream h
    )

    logits, gates = pl.pallas_call(
        partial(_fused_kernel, num_heads=num_heads, l_out=l_out, pool_k=pool_k),
        grid_spec=grid_spec,
        out_shape=(jax.ShapeDtypeStruct((1, n_ct), F32),
                   jax.ShapeDtypeStruct((NL, 1, 2), F32)),
        compiler_params=pltpu.CompilerParams(dimension_semantics=("arbitrary",)),
    )(x_col, packed["cve_vecs"], packed["cve_w2t"],
      packed["gconv"], packed["gvecs"], packed["glinb"],
      packed["wqkv"], packed["bqkv"], packed["wo"],
      packed["w1"], packed["b1"], packed["w2"], packed["evecs"],
      packed["head_wt"], packed["head_b"])

    masks = [gates[i, :, 0:1] for i in range(NL)]
    probs = [gates[i, :, 1:2] for i in range(NL)]
    return logits, masks, probs


# ============================================================================
# One-time parameter packing (all transposes / stacking hoisted out of forward)
# ============================================================================
def pack_params(params):
    emb = params["emb"]
    layers = params["layers"]

    def stack(fn):
        return jnp.stack([fn(lp) for lp in layers], axis=0)

    return {
        "cve_vecs": jnp.stack([emb["w1"], emb["b1"], emb["b2"], emb["ln_g"], emb["ln_b"]], 0),
        "cve_w2t": emb["w2"].T,
        "gconv": stack(lambda lp: jnp.transpose(lp["gate"]["conv_w"], (2, 1, 0))),
        "gvecs": stack(lambda lp: jnp.stack([lp["gate"]["conv_b"], lp["gate"]["bn_gamma"],
                                             lp["gate"]["bn_beta"], lp["gate"]["lin_w"][0]], 0)),
        "glinb": stack(lambda lp: lp["gate"]["lin_b"].reshape(1, 1)),
        "wqkv": stack(lambda lp: lp["enc"]["wqkv"].T),
        "bqkv": stack(lambda lp: lp["enc"]["bqkv"].reshape(1, -1)),
        "wo": stack(lambda lp: lp["enc"]["wo"].T),
        "w1": stack(lambda lp: lp["enc"]["w1"].T),
        "b1": stack(lambda lp: lp["enc"]["b1"].reshape(1, -1)),
        "w2": stack(lambda lp: lp["enc"]["w2"].T),
        "evecs": stack(lambda lp: jnp.stack([lp["enc"]["bo"], lp["enc"]["ln1_g"],
                                             lp["enc"]["ln1_b"], lp["enc"]["b2"],
                                             lp["enc"]["ln2_g"], lp["enc"]["ln2_b"]], 0)),
        "head_wt": params["head"]["w"].T,
        "head_b": params["head"]["b"].reshape(1, -1),
    }


# ============================================================================
# Plain-JAX reference (mirrors the PyTorch forward; validation only)
# ============================================================================
def _layernorm_ref(v, g, b, eps=LN_EPS):
    mu = v.mean(-1, keepdims=True)
    var = ((v - mu) ** 2).mean(-1, keepdims=True)
    return (v - mu) / jnp.sqrt(var + eps) * g + b


def cve_ref(x, p):
    xc = jnp.minimum(x, CVE_MAX_VALUE)[..., None]
    h = jax.nn.relu(xc * p["w1"] + p["b1"])
    h = jnp.einsum("bsd,ed->bse", h, p["w2"], precision=_HI) + p["b2"]
    return _layernorm_ref(h, p["ln_g"], p["ln_b"])


def conv_gate_ref(x, p, pool_size):
    xp = jnp.transpose(x, (0, 2, 1))
    y = jax.lax.conv_general_dilated(
        xp, p["conv_w"], window_strides=(CONV_STRIDE,), padding="VALID",
        dimension_numbers=("NCH", "OIH", "NCH"), precision=_HI)
    y = y + p["conv_b"][None, :, None]
    mean = jnp.mean(y, axis=(0, 2), keepdims=True)
    var = jnp.mean((y - mean) ** 2, axis=(0, 2), keepdims=True)
    y = (y - mean) / jnp.sqrt(var + BN_EPS)
    y = y * p["bn_gamma"][None, :, None] + p["bn_beta"][None, :, None]
    y = jnp.maximum(y, 0.0)
    pool_k = math.floor(pool_size / 2 + 0.5)
    Bn, Cn, Ln = y.shape
    n_win = Ln // pool_k
    pooled = y[:, :, :n_win * pool_k].reshape(Bn, Cn, n_win, pool_k).mean(axis=3)
    feat = pooled.mean(axis=2)
    logits = jnp.dot(feat, p["lin_w"].T, precision=_HI) + p["lin_b"]
    prob = jax.nn.sigmoid(logits)
    disc = (prob > 0.5).astype(F32)
    return disc, prob


def encoder_layer_ref(x2d, p, num_heads):
    S, d = x2d.shape
    dh = d // num_heads
    qkv = jnp.dot(x2d, p["wqkv"].T, precision=_HI) + p["bqkv"]
    q, k, v = qkv[:, :d], qkv[:, d:2 * d], qkv[:, 2 * d:]
    outs = []
    for hh in range(num_heads):
        sl = slice(hh * dh, (hh + 1) * dh)
        s = jnp.dot(q[:, sl], k[:, sl].T, precision=_HI) / math.sqrt(dh)
        outs.append(jnp.dot(jax.nn.softmax(s, axis=-1), v[:, sl], precision=_HI))
    attn = jnp.dot(jnp.concatenate(outs, axis=-1), p["wo"].T, precision=_HI) + p["bo"]
    h1 = _layernorm_ref(x2d + attn, p["ln1_g"], p["ln1_b"])
    ff = jax.nn.relu(jnp.dot(h1, p["w1"].T, precision=_HI) + p["b1"])
    ff = jnp.dot(ff, p["w2"].T, precision=_HI) + p["b2"]
    return _layernorm_ref(h1 + ff, p["ln2_g"], p["ln2_b"])


def model_ref(x, params, *, pool_size, num_heads):
    h = cve_ref(x, params["emb"])
    masks, probs = [], []
    for lp in params["layers"]:
        disc, prob = conv_gate_ref(h, lp["gate"], pool_size)
        enc = encoder_layer_ref(h[0], lp["enc"], num_heads)[None]
        m = disc[:, :, None]
        h = m * enc + (1.0 - m) * h
        masks.append(disc)
        probs.append(prob)
    feat = jnp.max(h, axis=1)
    logits = jnp.dot(feat, params["head"]["w"].T, precision=_HI) + params["head"]["b"]
    return logits, masks, probs


# ============================================================================
# Parameter construction (deterministic)
# ============================================================================
def _uniform(key, shape, scale):
    return jax.random.uniform(key, shape, F32, -scale, scale)


def init_gate_params(key, C):
    ks = jax.random.split(key, 4)
    s_conv = 1.0 / math.sqrt(C * CONV_K)
    s_lin = 1.0 / math.sqrt(C)
    return {"conv_w": _uniform(ks[0], (C, C, CONV_K), s_conv),
            "conv_b": _uniform(ks[1], (C,), s_conv),
            "bn_gamma": jnp.ones((C,), F32), "bn_beta": jnp.zeros((C,), F32),
            "lin_w": _uniform(ks[2], (1, C), s_lin),
            "lin_b": _uniform(ks[3], (1,), s_lin)}


def init_encoder_params(key, d, fc):
    ks = jax.random.split(key, 8)
    s, sf = 1.0 / math.sqrt(d), 1.0 / math.sqrt(fc)
    return {"wqkv": _uniform(ks[0], (3 * d, d), s), "bqkv": _uniform(ks[1], (3 * d,), s),
            "wo": _uniform(ks[2], (d, d), s), "bo": _uniform(ks[3], (d,), s),
            "ln1_g": jnp.ones((d,), F32), "ln1_b": jnp.zeros((d,), F32),
            "w1": _uniform(ks[4], (fc, d), s), "b1": _uniform(ks[5], (fc,), s),
            "w2": _uniform(ks[6], (d, fc), sf), "b2": _uniform(ks[7], (d,), sf),
            "ln2_g": jnp.ones((d,), F32), "ln2_b": jnp.zeros((d,), F32)}


def init_model_params(key, *, d, fc, num_layers, n_celltypes):
    k_emb, k_layers, k_head = jax.random.split(key, 3)
    ke = jax.random.split(k_emb, 4)
    emb = {"w1": _uniform(ke[0], (d,), 1.0), "b1": _uniform(ke[1], (d,), 1.0),
           "w2": _uniform(ke[2], (d, d), 1.0 / math.sqrt(d)),
           "b2": _uniform(ke[3], (d,), 1.0 / math.sqrt(d)),
           "ln_g": jnp.ones((d,), F32), "ln_b": jnp.zeros((d,), F32)}
    layers = []
    for kl in jax.random.split(k_layers, num_layers):
        kg, kenc = jax.random.split(kl)
        layers.append({"gate": init_gate_params(kg, d),
                       "enc": init_encoder_params(kenc, d, fc)})
    kh = jax.random.split(k_head, 2)
    head = {"w": _uniform(kh[0], (n_celltypes, d), 1.0 / math.sqrt(d)),
            "b": _uniform(kh[1], (n_celltypes,), 1.0 / math.sqrt(d))}
    return {"emb": emb, "layers": layers, "head": head}


# ============================================================================
if __name__ == "__main__":
    key = jax.random.PRNGKey(0)
    k_x, k_p = jax.random.split(key)

    # allow_batch=False => batch size must be 1, as in the PyTorch module.
    SEQ, D, HEADS, FC, N_LAYERS, N_CT, POOL = 16, 32, 4, 32, 3, 6, 5
    params = init_model_params(k_p, d=D, fc=FC, num_layers=N_LAYERS, n_celltypes=N_CT)
    packed = pack_params(params)                               # one-time weight packing
    x = jax.random.uniform(k_x, (1, SEQ), F32, 0.0, 12.0)      # exercises clamp(max=10)

    fwd = jax.jit(partial(model_forward, pool_size=POOL, num_heads=HEADS))
    logits, masks, probs = jax.block_until_ready(fwd(x, packed))
    logits_r, masks_r, probs_r = model_ref(x, params, pool_size=POOL, num_heads=HEADS)

    assert logits.shape == (1, N_CT)
    # Tolerances absorb the EUP approx-reciprocal used for the softmax denominator.
    assert jnp.allclose(logits, logits_r, atol=1e-2, rtol=1e-2), (logits, logits_r)
    for m, mr, pp, pr in zip(masks, masks_r, probs, probs_r):
        assert m.shape == (1, 1) and pp.shape == (1, 1)
        assert jnp.array_equal(m, mr), (m, mr)
        assert jnp.allclose(pp, pr, atol=2e-3, rtol=2e-3), (pp, pr)

    print("KERNEL_OK")
</pallas_src>

<mosaic_0001>
module attributes {stable_mosaic.version = 11 : i64} {
  func.func @_fused_kernel(%arg0: i32, %arg1: memref<16x1xf32, #tpu.memory_space<vmem>>, %arg2: memref<5x32xf32, #tpu.memory_space<vmem>>, %arg3: memref<32x32xf32, #tpu.memory_space<vmem>>, %arg4: memref<1x3x32x32xf32, #tpu.memory_space<vmem>>, %arg5: memref<1x4x32xf32, #tpu.memory_space<vmem>>, %arg6: memref<1x1x1xf32, #tpu.memory_space<vmem>>, %arg7: memref<1x32x96xf32, #tpu.memory_space<vmem>>, %arg8: memref<1x1x96xf32, #tpu.memory_space<vmem>>, %arg9: memref<1x32x32xf32, #tpu.memory_space<vmem>>, %arg10: memref<1x32x32xf32, #tpu.memory_space<vmem>>, %arg11: memref<1x1x32xf32, #tpu.memory_space<vmem>>, %arg12: memref<1x32x32xf32, #tpu.memory_space<vmem>>, %arg13: memref<1x6x32xf32, #tpu.memory_space<vmem>>, %arg14: memref<32x6xf32, #tpu.memory_space<vmem>>, %arg15: memref<1x6xf32, #tpu.memory_space<vmem>>, %arg16: memref<1x6xf32, #tpu.memory_space<vmem>>, %arg17: memref<1x1x2xf32, #tpu.memory_space<vmem>>, %arg18: memref<16x32xf32, #tpu.memory_space<vmem>>) attributes {dimension_semantics = [#tpu.dimension_semantics<arbitrary>], iteration_bounds = array<i64: 3>, scalar_prefetch = 0 : i64, scratch_operands = 1 : i64, tpu.core_type = #tpu.core_type<tc>, window_params = [{pipeline_mode = #tpu.pipeline_mode<synchronous>, transform_indices = @transform_0, window_bounds = array<i64: 16, 1>}, {pipeline_mode = #tpu.pipeline_mode<synchronous>, transform_indices = @transform_1, window_bounds = array<i64: 5, 32>}, {pipeline_mode = #tpu.pipeline_mode<synchronous>, transform_indices = @transform_2, window_bounds = array<i64: 32, 32>}, {transform_indices = @transform_3, window_bounds = array<i64: 1, 3, 32, 32>}, {transform_indices = @transform_4, window_bounds = array<i64: 1, 4, 32>}, {transform_indices = @transform_5, window_bounds = array<i64: 1, 1, 1>}, {transform_indices = @transform_6, window_bounds = array<i64: 1, 32, 96>}, {transform_indices = @transform_7, window_bounds = array<i64: 1, 1, 96>}, {transform_indices = @transform_8, window_bounds = array<i64: 1, 32, 32>}, {transform_indices = @transform_9, window_bounds = array<i64: 1, 32, 32>}, {transform_indices = @transform_10, window_bounds = array<i64: 1, 1, 32>}, {transform_indices = @transform_11, window_bounds = array<i64: 1, 32, 32>}, {transform_indices = @transform_12, window_bounds = array<i64: 1, 6, 32>}, {pipeline_mode = #tpu.pipeline_mode<synchronous>, transform_indices = @transform_13, window_bounds = array<i64: 32, 6>}, {pipeline_mode = #tpu.pipeline_mode<synchronous>, transform_indices = @transform_14, window_bounds = array<i64: 1, 6>}, {pipeline_mode = #tpu.pipeline_mode<synchronous>, transform_indices = @transform_15, window_bounds = array<i64: 1, 6>}, {transform_indices = @transform_16, window_bounds = array<i64: 1, 1, 2>}]} {
    %c0_i32 = arith.constant 0 : i32
    %0 = arith.cmpi eq, %arg0, %c0_i32 : i32
    %1 = arith.extui %0 : i1 to i32
    %c0_i32_0 = arith.constant 0 : i32
    %2 = arith.cmpi ne, %1, %c0_i32_0 : i32
    scf.if %2 {
      %c0_128 = arith.constant 0 : index
      %c0_129 = arith.constant 0 : index
      %252 = vector.load %arg1[%c0_128, %c0_129] : memref<16x1xf32, #tpu.memory_space<vmem>>, vector<16x1xf32>
      %cst_130 = arith.constant 1.000000e+01 : f32
      %253 = vector.broadcast %cst_130 : f32 to vector<16x1xf32>
      %254 = arith.minimumf %252, %253 : vector<16x1xf32>
      %c0_131 = arith.constant 0 : index
      %c0_132 = arith.constant 0 : index
      %255 = vector.load %arg2[%c0_131, %c0_132] : memref<5x32xf32, #tpu.memory_space<vmem>>, vector<1x32xf32>
      %256 = vector.broadcast %254 : vector<16x1xf32> to vector<16x32xf32>
      %257 = vector.broadcast %255 : vector<1x32xf32> to vector<16x32xf32>
      %258 = arith.mulf %256, %257 : vector<16x32xf32>
      %c1_133 = arith.constant 1 : index
      %c0_134 = arith.constant 0 : index
      %259 = vector.load %arg2[%c1_133, %c0_134] : memref<5x32xf32, #tpu.memory_space<vmem>>, vector<1x32xf32>
      %260 = vector.broadcast %259 : vector<1x32xf32> to vector<16x32xf32>
      %261 = arith.addf %258, %260 : vector<16x32xf32>
      %cst_135 = arith.constant 0.000000e+00 : f32
      %262 = vector.broadcast %cst_135 : f32 to vector<16x32xf32>
      %263 = arith.maximumf %261, %262 : vector<16x32xf32>
      %c0_136 = arith.constant 0 : index
      %c0_137 = arith.constant 0 : index
      %264 = vector.load %arg3[%c0_136, %c0_137] : memref<32x32xf32, #tpu.memory_space<vmem>>, vector<32x32xf32>
      %cst_138 = arith.constant dense<0.000000e+00> : vector<16x32xf32>
      %265 = tpu.matmul %263, %264, %cst_138 {dimension_numbers = #tpu.dot_dimension_numbers<[1], [0], [0], [1], [0, 0, 1, 1], [], []>} : vector<16x32xf32>, vector<32x32xf32>, vector<16x32xf32> -> vector<16x32xf32>
      %c2_139 = arith.constant 2 : index
      %c0_140 = arith.constant 0 : index
      %266 = vector.load %arg2[%c2_139, %c0_140] : memref<5x32xf32, #tpu.memory_space<vmem>>, vector<1x32xf32>
      %267 = vector.broadcast %266 : vector<1x32xf32> to vector<16x32xf32>
      %268 = arith.addf %265, %267 : vector<16x32xf32>
      %c3_141 = arith.constant 3 : index
      %c0_142 = arith.constant 0 : index
      %269 = vector.load %arg2[%c3_141, %c0_142] : memref<5x32xf32, #tpu.memory_space<vmem>>, vector<1x32xf32>
      %c4_143 = arith.constant 4 : index
      %c0_144 = arith.constant 0 : index
      %270 = vector.load %arg2[%c4_143, %c0_144] : memref<5x32xf32, #tpu.memory_space<vmem>>, vector<1x32xf32>
      %cst_145 = arith.constant dense<0.000000e+00> : vector<16xf32>
      %271 = vector.multi_reduction <add>, %268, %cst_145 [1] : vector<16x32xf32> to vector<16xf32>
      %272 = vector.shape_cast %271 : vector<16xf32> to vector<16x1xf32>
      %cst_146 = arith.constant 3.200000e+01 : f32
      %273 = vector.broadcast %cst_146 : f32 to vector<16x1xf32>
      %274 = arith.divf %272, %273 : vector<16x1xf32>
      %275 = vector.broadcast %274 : vector<16x1xf32> to vector<16x32xf32>
      %276 = arith.subf %268, %275 : vector<16x32xf32>
      %277 = arith.mulf %276, %276 : vector<16x32xf32>
      %cst_147 = arith.constant dense<0.000000e+00> : vector<16xf32>
      %278 = vector.multi_reduction <add>, %277, %cst_147 [1] : vector<16x32xf32> to vector<16xf32>
      %279 = vector.shape_cast %278 : vector<16xf32> to vector<16x1xf32>
      %cst_148 = arith.constant 3.200000e+01 : f32
      %280 = vector.broadcast %cst_148 : f32 to vector<16x1xf32>
      %281 = arith.divf %279, %280 : vector<16x1xf32>
      %cst_149 = arith.constant 9.99999974E-6 : f32
      %282 = vector.broadcast %cst_149 : f32 to vector<16x1xf32>
      %283 = arith.addf %281, %282 : vector<16x1xf32>
      %284 = math.rsqrt %283 : vector<16x1xf32>
      %285 = vector.broadcast %284 : vector<16x1xf32> to vector<16x32xf32>
      %286 = arith.mulf %276, %285 : vector<16x32xf32>
      %287 = vector.broadcast %269 : vector<1x32xf32> to vector<16x32xf32>
      %288 = arith.mulf %286, %287 : vector<16x32xf32>
      %289 = vector.broadcast %270 : vector<1x32xf32> to vector<16x32xf32>
      %290 = arith.addf %288, %289 : vector<16x32xf32>
      %c0_150 = arith.constant 0 : index
      %c0_151 = arith.constant 0 : index
      %291 = vector.load %arg18[%c0_150, %c0_151] : memref<16x32xf32, #tpu.memory_space<vmem>>, vector<16x32xf32>
      tpu.vector_store %arg18[%c0_150, %c0_151], %290 {strides = array<i32>} : memref<16x32xf32, #tpu.memory_space<vmem>>, vector<16x32xf32>,
    } else {
    }
    %c0 = arith.constant 0 : index
    %c0_1 = arith.constant 0 : index
    %3 = vector.load %arg18[%c0, %c0_1] : memref<16x32xf32, #tpu.memory_space<vmem>>, vector<16x32xf32>
    %cst = arith.constant 0.000000e+00 : f32
    %4 = vector.broadcast %cst : f32 to vector<7x32xf32>
    %c0_2 = arith.constant 0 : index
    %c0_3 = arith.constant 0 : index
    %5 = tpu.strided_load %arg18[%c0_2, %c0_3] {strides = array<i32: 2, 1>} : memref<16x32xf32, #tpu.memory_space<vmem>>, vector<7x32xf32>
    %c0_4 = arith.constant 0 : index
    %c0_5 = arith.constant 0 : index
    %c0_6 = arith.constant 0 : index
    %c0_7 = arith.constant 0 : index
    %6 = vector.load %arg4[%c0_4, %c0_5, %c0_6, %c0_7] : memref<1x3x32x32xf32, #tpu.memory_space<vmem>>, vector<1x1x32x32xf32>
    %7 = vector.shape_cast %6 : vector<1x1x32x32xf32> to vector<32x32xf32>
    %cst_8 = arith.constant dense<0.000000e+00> : vector<7x32xf32>
    %8 = tpu.matmul %5, %7, %cst_8 {dimension_numbers = #tpu.dot_dimension_numbers<[1], [0], [0], [1], [0, 0, 1, 1], [], []>} : vector<7x32xf32>, vector<32x32xf32>, vector<7x32xf32> -> vector<7x32xf32>
    %9 = arith.addf %4, %8 : vector<7x32xf32>
    %c1 = arith.constant 1 : index
    %c0_9 = arith.constant 0 : index
    %10 = tpu.strided_load %arg18[%c1, %c0_9] {strides = array<i32: 2, 1>} : memref<16x32xf32, #tpu.memory_space<vmem>>, vector<7x32xf32>
    %c0_10 = arith.constant 0 : index
    %c1_11 = arith.constant 1 : index
    %c0_12 = arith.constant 0 : index
    %c0_13 = arith.constant 0 : index
    %11 = vector.load %arg4[%c0_10, %c1_11, %c0_12, %c0_13] : memref<1x3x32x32xf32, #tpu.memory_space<vmem>>, vector<1x1x32x32xf32>
    %12 = vector.shape_cast %11 : vector<1x1x32x32xf32> to vector<32x32xf32>
    %cst_14 = arith.constant dense<0.000000e+00> : vector<7x32xf32>
    %13 = tpu.matmul %10, %12, %cst_14 {dimension_numbers = #tpu.dot_dimension_numbers<[1], [0], [0], [1], [0, 0, 1, 1], [], []>} : vector<7x32xf32>, vector<32x32xf32>, vector<7x32xf32> -> vector<7x32xf32>
    %14 = arith.addf %9, %13 : vector<7x32xf32>
    %c2 = arith.constant 2 : index
    %c0_15 = arith.constant 0 : index
    %15 = tpu.strided_load %arg18[%c2, %c0_15] {strides = array<i32: 2, 1>} : memref<16x32xf32, #tpu.memory_space<vmem>>, vector<7x32xf32>
    %c0_16 = arith.constant 0 : index
    %c2_17 = arith.constant 2 : index
    %c0_18 = arith.constant 0 : index
    %c0_19 = arith.constant 0 : index
    %16 = vector.load %arg4[%c0_16, %c2_17, %c0_18, %c0_19] : memref<1x3x32x32xf32, #tpu.memory_space<vmem>>, vector<1x1x32x32xf32>
    %17 = vector.shape_cast %16 : vector<1x1x32x32xf32> to vector<32x32xf32>
    %cst_20 = arith.constant dense<0.000000e+00> : vector<7x32xf32>
    %18 = tpu.matmul %15, %17, %cst_20 {dimension_numbers = #tpu.dot_dimension_numbers<[1], [0], [0], [1], [0, 0, 1, 1], [], []>} : vector<7x32xf32>, vector<32x32xf32>, vector<7x32xf32> -> vector<7x32xf32>
    %19 = arith.addf %14, %18 : vector<7x32xf32>
    %c0_21 = arith.constant 0 : index
    %c0_22 = arith.constant 0 : index
    %c0_23 = arith.constant 0 : index
    %20 = vector.load %arg5[%c0_21, %c0_22, %c0_23] : memref<1x4x32xf32, #tpu.memory_space<vmem>>, vector<1x1x32xf32>
    %21 = vector.shape_cast %20 : vector<1x1x32xf32> to vector<1x32xf32>
    %22 = vector.broadcast %21 : vector<1x32xf32> to vector<7x32xf32>
    %23 = arith.addf %19, %22 : vector<7x32xf32>
    %cst_24 = arith.constant dense<0.000000e+00> : vector<32xf32>
    %24 = vector.multi_reduction <add>, %23, %cst_24 [0] : vector<7x32xf32> to vector<32xf32>
    %25 = vector.shape_cast %24 : vector<32xf32> to vector<1x32xf32>
    %cst_25 = arith.constant 7.000000e+00 : f32
    %26 = vector.broadcast %cst_25 : f32 to vector<1x32xf32>
    %27 = arith.divf %25, %26 : vector<1x32xf32>
    %28 = vector.broadcast %27 : vector<1x32xf32> to vector<7x32xf32>
    %29 = arith.subf %23, %28 : vector<7x32xf32>
    %30 = arith.mulf %29, %29 : vector<7x32xf32>
    %cst_26 = arith.constant dense<0.000000e+00> : vector<32xf32>
    %31 = vector.multi_reduction <add>, %30, %cst_26 [0] : vector<7x32xf32> to vector<32xf32>
    %32 = vector.shape_cast %31 : vector<32xf32> to vector<1x32xf32>
    %cst_27 = arith.constant 7.000000e+00 : f32
    %33 = vector.broadcast %cst_27 : f32 to vector<1x32xf32>
    %34 = arith.divf %32, %33 : vector<1x32xf32>
    %c0_28 = arith.constant 0 : index
    %c1_29 = arith.constant 1 : index
    %c0_30 = arith.constant 0 : index
    %35 = vector.load %arg5[%c0_28, %c1_29, %c0_30] : memref<1x4x32xf32, #tpu.memory_space<vmem>>, vector<1x1x32xf32>
    %36 = vector.shape_cast %35 : vector<1x1x32xf32> to vector<1x32xf32>
    %cst_31 = arith.constant 9.99999974E-6 : f32
    %37 = vector.broadcast %cst_31 : f32 to vector<1x32xf32>
    %38 = arith.addf %34, %37 : vector<1x32xf32>
    %39 = math.rsqrt %38 : vector<1x32xf32>
    %40 = arith.mulf %36, %39 : vector<1x32xf32>
    %41 = vector.broadcast %40 : vector<1x32xf32> to vector<7x32xf32>
    %42 = arith.mulf %29, %41 : vector<7x32xf32>
    %c0_32 = arith.constant 0 : index
    %c2_33 = arith.constant 2 : index
    %c0_34 = arith.constant 0 : index
    %43 = vector.load %arg5[%c0_32, %c2_33, %c0_34] : memref<1x4x32xf32, #tpu.memory_space<vmem>>, vector<1x1x32xf32>
    %44 = vector.shape_cast %43 : vector<1x1x32xf32> to vector<1x32xf32>
    %45 = vector.broadcast %44 : vector<1x32xf32> to vector<7x32xf32>
    %46 = arith.addf %42, %45 : vector<7x32xf32>
    %cst_35 = arith.constant 0.000000e+00 : f32
    %47 = vector.broadcast %cst_35 : f32 to vector<7x32xf32>
    %48 = arith.maximumf %46, %47 : vector<7x32xf32>
    %49 = vector.extract_strided_slice %48 {offsets = [0, 0], sizes = [6, 32], strides = [1, 1]} : vector<7x32xf32> to vector<6x32xf32>
    %cst_36 = arith.constant dense<0.000000e+00> : vector<32xf32>
    %50 = vector.multi_reduction <add>, %49, %cst_36 [0] : vector<6x32xf32> to vector<32xf32>
    %51 = vector.shape_cast %50 : vector<32xf32> to vector<1x32xf32>
    %cst_37 = arith.constant 6.000000e+00 : f32
    %52 = vector.broadcast %cst_37 : f32 to vector<1x32xf32>
    %53 = arith.divf %51, %52 : vector<1x32xf32>
    %c0_38 = arith.constant 0 : index
    %c3 = arith.constant 3 : index
    %c0_39 = arith.constant 0 : index
    %54 = vector.load %arg5[%c0_38, %c3, %c0_39] : memref<1x4x32xf32, #tpu.memory_space<vmem>>, vector<1x1x32xf32>
    %55 = vector.shape_cast %54 : vector<1x1x32xf32> to vector<1x32xf32>
    %56 = arith.mulf %53, %55 : vector<1x32xf32>
    %cst_40 = arith.constant dense<0.000000e+00> : vector<1xf32>
    %57 = vector.multi_reduction <add>, %56, %cst_40 [1] : vector<1x32xf32> to vector<1xf32>
    %58 = vector.shape_cast %57 : vector<1xf32> to vector<1x1xf32>
    %c0_41 = arith.constant 0 : index
    %c0_42 = arith.constant 0 : index
    %c0_43 = arith.constant 0 : index
    %59 = vector.load %arg6[%c0_41, %c0_42, %c0_43] : memref<1x1x1xf32, #tpu.memory_space<vmem>>, vector<1x1x1xf32>
    %60 = vector.shape_cast %59 : vector<1x1x1xf32> to vector<1x1xf32>
    %61 = arith.addf %58, %60 : vector<1x1xf32>
    %cst_44 = arith.constant 0.000000e+00 : f32
    %62 = vector.broadcast %cst_44 : f32 to vector<1x1xf32>
    %63 = arith.subf %62, %61 : vector<1x1xf32>
    %64 = math.exp %63 : vector<1x1xf32>
    %cst_45 = arith.constant 1.000000e+00 : f32
    %65 = vector.broadcast %cst_45 : f32 to vector<1x1xf32>
    %66 = arith.addf %65, %64 : vector<1x1xf32>
    %cst_46 = arith.constant 1.000000e+00 : f32
    %67 = vector.broadcast %cst_46 : f32 to vector<1x1xf32>
    %68 = arith.divf %67, %66 : vector<1x1xf32>
    %cst_47 = arith.constant 5.000000e-01 : f32
    %69 = vector.broadcast %cst_47 : f32 to vector<1x1xf32>
    %70 = arith.cmpf ogt, %68, %69 : vector<1x1xf32>
    %71 = arith.extui %70 : vector<1x1xi1> to vector<1x1xi32>
    %72 = arith.sitofp %71 : vector<1x1xi32> to vector<1x1xf32>
    %73 = tpu.concatenate %72, %68 in 1 : vector<1x1xf32>, vector<1x1xf32> -> vector<1x2xf32>
    %c0_48 = arith.constant 0 : index
    %c0_49 = arith.constant 0 : index
    %c0_50 = arith.constant 0 : index
    %74 = vector.load %arg17[%c0_48, %c0_49, %c0_50] : memref<1x1x2xf32, #tpu.memory_space<vmem>>, vector<1x1x2xf32>
    %75 = vector.shape_cast %74 : vector<1x1x2xf32> to vector<1x2xf32>
    %76 = vector.shape_cast %73 : vector<1x2xf32> to vector<1x1x2xf32>
    tpu.vector_store %arg17[%c0_48, %c0_49, %c0_50], %76 {strides = array<i32>} : memref<1x1x2xf32, #tpu.memory_space<vmem>>, vector<1x1x2xf32>,
    %c0_51 = arith.constant 0 : index
    %c0_52 = arith.constant 0 : index
    %c0_53 = arith.constant 0 : index
    %77 = vector.load %arg7[%c0_51, %c0_52, %c0_53] : memref<1x32x96xf32, #tpu.memory_space<vmem>>, vector<1x32x96xf32>
    %78 = vector.shape_cast %77 : vector<1x32x96xf32> to vector<32x96xf32>
    %cst_54 = arith.constant dense<0.000000e+00> : vector<16x96xf32>
    %79 = tpu.matmul %3, %78, %cst_54 {dimension_numbers = #tpu.dot_dimension_numbers<[1], [0], [0], [1], [0, 0, 1, 1], [], []>} : vector<16x32xf32>, vector<32x96xf32>, vector<16x96xf32> -> vector<16x96xf32>
    %c0_55 = arith.constant 0 : index
    %c0_56 = arith.constant 0 : index
    %c0_57 = arith.constant 0 : index
    %80 = vector.load %arg8[%c0_55, %c0_56, %c0_57] : memref<1x1x96xf32, #tpu.memory_space<vmem>>, vector<1x1x96xf32>
    %81 = vector.shape_cast %80 : vector<1x1x96xf32> to vector<1x96xf32>
    %82 = vector.broadcast %81 : vector<1x96xf32> to vector<16x96xf32>
    %83 = arith.addf %79, %82 : vector<16x96xf32>
    %c0_58 = arith.constant 0 : index
    %c0_59 = arith.constant 0 : index
    %c0_60 = arith.constant 0 : index
    %84 = vector.load %arg9[%c0_58, %c0_59, %c0_60] : memref<1x32x32xf32, #tpu.memory_space<vmem>>, vector<1x32x32xf32>
    %85 = vector.shape_cast %84 : vector<1x32x32xf32> to vector<32x32xf32>
    %cst_61 = arith.constant 0.000000e+00 : f32
    %86 = vector.broadcast %cst_61 : f32 to vector<16x32xf32>
    %87 = vector.extract_strided_slice %83 {offsets = [0, 0], sizes = [16, 8], strides = [1, 1]} : vector<16x96xf32> to vector<16x8xf32>
    %88 = vector.extract_strided_slice %83 {offsets = [0, 32], sizes = [16, 8], strides = [1, 1]} : vector<16x96xf32> to vector<16x8xf32>
    %89 = vector.extract_strided_slice %83 {offsets = [0, 64], sizes = [16, 8], strides = [1, 1]} : vector<16x96xf32> to vector<16x8xf32>
    %90 = tpu.transpose %88, [1, 0] : vector<16x8xf32> -> vector<8x16xf32>
    %cst_62 = arith.constant dense<0.000000e+00> : vector<16x16xf32>
    %91 = tpu.matmul %87, %90, %cst_62 {dimension_numbers = #tpu.dot_dimension_numbers<[1], [0], [0], [1], [0, 0, 1, 1], [], []>} : vector<16x8xf32>, vector<8x16xf32>, vector<16x16xf32> -> vector<16x16xf32>
    %cst_63 = arith.constant 0.353553385 : f32
    %92 = vector.broadcast %cst_63 : f32 to vector<16x16xf32>
    %93 = arith.mulf %91, %92 : vector<16x16xf32>
    %cst_64 = arith.constant dense<0xFF800000> : vector<16xf32>
    %94 = vector.multi_reduction <maximumf>, %93, %cst_64 [1] : vector<16x16xf32> to vector<16xf32>
    %95 = vector.shape_cast %94 : vector<16xf32> to vector<16x1xf32>
    %96 = vector.broadcast %95 : vector<16x1xf32> to vector<16x16xf32>
    %97 = arith.subf %93, %96 : vector<16x16xf32>
    %98 = math.exp %97 : vector<16x16xf32>
    %cst_65 = arith.constant dense<0.000000e+00> : vector<16xf32>
    %99 = vector.multi_reduction <add>, %98, %cst_65 [1] : vector<16x16xf32> to vector<16xf32>
    %100 = vector.shape_cast %99 : vector<16xf32> to vector<16x1xf32>
    %101 = tpu.reciprocal %100 {approx = true} : vector<16x1xf32> -> vector<16x1xf32>
    %102 = vector.broadcast %101 : vector<16x1xf32> to vector<16x16xf32>
    %103 = arith.mulf %98, %102 : vector<16x16xf32>
    %cst_66 = arith.constant dense<0.000000e+00> : vector<16x8xf32>
    %104 = tpu.matmul %103, %89, %cst_66 {dimension_numbers = #tpu.dot_dimension_numbers<[1], [0], [0], [1], [0, 0, 1, 1], [], []>} : vector<16x16xf32>, vector<16x8xf32>, vector<16x8xf32> -> vector<16x8xf32>
    %105 = vector.extract_strided_slice %85 {offsets = [0, 0], sizes = [8, 32], strides = [1, 1]} : vector<32x32xf32> to vector<8x32xf32>
    %cst_67 = arith.constant dense<0.000000e+00> : vector<16x32xf32>
    %106 = tpu.matmul %104, %105, %cst_67 {dimension_numbers = #tpu.dot_dimension_numbers<[1], [0], [0], [1], [0, 0, 1, 1], [], []>} : vector<16x8xf32>, vector<8x32xf32>, vector<16x32xf32> -> vector<16x32xf32>
    %107 = arith.addf %86, %106 : vector<16x32xf32>
    %108 = vector.extract_strided_slice %83 {offsets = [0, 8], sizes = [16, 8], strides = [1, 1]} : vector<16x96xf32> to vector<16x8xf32>
    %109 = vector.extract_strided_slice %83 {offsets = [0, 40], sizes = [16, 8], strides = [1, 1]} : vector<16x96xf32> to vector<16x8xf32>
    %110 = vector.extract_strided_slice %83 {offsets = [0, 72], sizes = [16, 8], strides = [1, 1]} : vector<16x96xf32> to vector<16x8xf32>
    %111 = tpu.transpose %109, [1, 0] : vector<16x8xf32> -> vector<8x16xf32>
    %cst_68 = arith.constant dense<0.000000e+00> : vector<16x16xf32>
    %112 = tpu.matmul %108, %111, %cst_68 {dimension_numbers = #tpu.dot_dimension_numbers<[1], [0], [0], [1], [0, 0, 1, 1], [], []>} : vector<16x8xf32>, vector<8x16xf32>, vector<16x16xf32> -> vector<16x16xf32>
    %cst_69 = arith.constant 0.353553385 : f32
    %113 = vector.broadcast %cst_69 : f32 to vector<16x16xf32>
    %114 = arith.mulf %112, %113 : vector<16x16xf32>
    %cst_70 = arith.constant dense<0xFF800000> : vector<16xf32>
    %115 = vector.multi_reduction <maximumf>, %114, %cst_70 [1] : vector<16x16xf32> to vector<16xf32>
    %116 = vector.shape_cast %115 : vector<16xf32> to vector<16x1xf32>
    %117 = vector.broadcast %116 : vector<16x1xf32> to vector<16x16xf32>
    %118 = arith.subf %114, %117 : vector<16x16xf32>
    %119 = math.exp %118 : vector<16x16xf32>
    %cst_71 = arith.constant dense<0.000000e+00> : vector<16xf32>
    %120 = vector.multi_reduction <add>, %119, %cst_71 [1] : vector<16x16xf32> to vector<16xf32>
    %121 = vector.shape_cast %120 : vector<16xf32> to vector<16x1xf32>
    %122 = tpu.reciprocal %121 {approx = true} : vector<16x1xf32> -> vector<16x1xf32>
    %123 = vector.broadcast %122 : vector<16x1xf32> to vector<16x16xf32>
    %124 = arith.mulf %119, %123 : vector<16x16xf32>
    %cst_72 = arith.constant dense<0.000000e+00> : vector<16x8xf32>
    %125 = tpu.matmul %124, %110, %cst_72 {dimension_numbers = #tpu.dot_dimension_numbers<[1], [0], [0], [1], [0, 0, 1, 1], [], []>} : vector<16x16xf32>, vector<16x8xf32>, vector<16x8xf32> -> vector<16x8xf32>
    %126 = vector.extract_strided_slice %85 {offsets = [8, 0], sizes = [8, 32], strides = [1, 1]} : vector<32x32xf32> to vector<8x32xf32>
    %cst_73 = arith.constant dense<0.000000e+00> : vector<16x32xf32>
    %127 = tpu.matmul %125, %126, %cst_73 {dimension_numbers = #tpu.dot_dimension_numbers<[1], [0], [0], [1], [0, 0, 1, 1], [], []>} : vector<16x8xf32>, vector<8x32xf32>, vector<16x32xf32> -> vector<16x32xf32>
    %128 = arith.addf %107, %127 : vector<16x32xf32>
    %129 = vector.extract_strided_slice %83 {offsets = [0, 16], sizes = [16, 8], strides = [1, 1]} : vector<16x96xf32> to vector<16x8xf32>
    %130 = vector.extract_strided_slice %83 {offsets = [0, 48], sizes = [16, 8], strides = [1, 1]} : vector<16x96xf32> to vector<16x8xf32>
    %131 = vector.extract_strided_slice %83 {offsets = [0, 80], sizes = [16, 8], strides = [1, 1]} : vector<16x96xf32> to vector<16x8xf32>
    %132 = tpu.transpose %130, [1, 0] : vector<16x8xf32> -> vector<8x16xf32>
    %cst_74 = arith.constant dense<0.000000e+00> : vector<16x16xf32>
    %133 = tpu.matmul %129, %132, %cst_74 {dimension_numbers = #tpu.dot_dimension_numbers<[1], [0], [0], [1], [0, 0, 1, 1], [], []>} : vector<16x8xf32>, vector<8x16xf32>, vector<16x16xf32> -> vector<16x16xf32>
    %cst_75 = arith.constant 0.353553385 : f32
    %134 = vector.broadcast %cst_75 : f32 to vector<16x16xf32>
    %135 = arith.mulf %133, %134 : vector<16x16xf32>
    %cst_76 = arith.constant dense<0xFF800000> : vector<16xf32>
    %136 = vector.multi_reduction <maximumf>, %135, %cst_76 [1] : vector<16x16xf32> to vector<16xf32>
    %137 = vector.shape_cast %136 : vector<16xf32> to vector<16x1xf32>
    %138 = vector.broadcast %137 : vector<16x1xf32> to vector<16x16xf32>
    %139 = arith.subf %135, %138 : vector<16x16xf32>
    %140 = math.exp %139 : vector<16x16xf32>
    %cst_77 = arith.constant dense<0.000000e+00> : vector<16xf32>
    %141 = vector.multi_reduction <add>, %140, %cst_77 [1] : vector<16x16xf32> to vector<16xf32>
    %142 = vector.shape_cast %141 : vector<16xf32> to vector<16x1xf32>
    %143 = tpu.reciprocal %142 {approx = true} : vector<16x1xf32> -> vector<16x1xf32>
    %144 = vector.broadcast %143 : vector<16x1xf32> to vector<16x16xf32>
    %145 = arith.mulf %140, %144 : vector<16x16xf32>
    %cst_78 = arith.constant dense<0.000000e+00> : vector<16x8xf32>
    %146 = tpu.matmul %145, %131, %cst_78 {dimension_numbers = #tpu.dot_dimension_numbers<[1], [0], [0], [1], [0, 0, 1, 1], [], []>} : vector<16x16xf32>, vector<16x8xf32>, vector<16x8xf32> -> vector<16x8xf32>
    %147 = vector.extract_strided_slice %85 {offsets = [16, 0], sizes = [8, 32], strides = [1, 1]} : vector<32x32xf32> to vector<8x32xf32>
    %cst_79 = arith.constant dense<0.000000e+00> : vector<16x32xf32>
    %148 = tpu.matmul %146, %147, %cst_79 {dimension_numbers = #tpu.dot_dimension_numbers<[1], [0], [0], [1], [0, 0, 1, 1], [], []>} : vector<16x8xf32>, vector<8x32xf32>, vector<16x32xf32> -> vector<16x32xf32>
    %149 = arith.addf %128, %148 : vector<16x32xf32>
    %150 = vector.extract_strided_slice %83 {offsets = [0, 24], sizes = [16, 8], strides = [1, 1]} : vector<16x96xf32> to vector<16x8xf32>
    %151 = vector.extract_strided_slice %83 {offsets = [0, 56], sizes = [16, 8], strides = [1, 1]} : vector<16x96xf32> to vector<16x8xf32>
    %152 = vector.extract_strided_slice %83 {offsets = [0, 88], sizes = [16, 8], strides = [1, 1]} : vector<16x96xf32> to vector<16x8xf32>
    %153 = tpu.transpose %151, [1, 0] : vector<16x8xf32> -> vector<8x16xf32>
    %cst_80 = arith.constant dense<0.000000e+00> : vector<16x16xf32>
    %154 = tpu.matmul %150, %153, %cst_80 {dimension_numbers = #tpu.dot_dimension_numbers<[1], [0], [0], [1], [0, 0, 1, 1], [], []>} : vector<16x8xf32>, vector<8x16xf32>, vector<16x16xf32> -> vector<16x16xf32>
    %cst_81 = arith.constant 0.353553385 : f32
    %155 = vector.broadcast %cst_81 : f32 to vector<16x16xf32>
    %156 = arith.mulf %154, %155 : vector<16x16xf32>
    %cst_82 = arith.constant dense<0xFF800000> : vector<16xf32>
    %157 = vector.multi_reduction <maximumf>, %156, %cst_82 [1] : vector<16x16xf32> to vector<16xf32>
    %158 = vector.shape_cast %157 : vector<16xf32> to vector<16x1xf32>
    %159 = vector.broadcast %158 : vector<16x1xf32> to vector<16x16xf32>
    %160 = arith.subf %156, %159 : vector<16x16xf32>
    %161 = math.exp %160 : vector<16x16xf32>
    %cst_83 = arith.constant dense<0.000000e+00> : vector<16xf32>
    %162 = vector.multi_reduction <add>, %161, %cst_83 [1] : vector<16x16xf32> to vector<16xf32>
    %163 = vector.shape_cast %162 : vector<16xf32> to vector<16x1xf32>
    %164 = tpu.reciprocal %163 {approx = true} : vector<16x1xf32> -> vector<16x1xf32>
    %165 = vector.broadcast %164 : vector<16x1xf32> to vector<16x16xf32>
    %166 = arith.mulf %161, %165 : vector<16x16xf32>
    %cst_84 = arith.constant dense<0.000000e+00> : vector<16x8xf32>
    %167 = tpu.matmul %166, %152, %cst_84 {dimension_numbers = #tpu.dot_dimension_numbers<[1], [0], [0], [1], [0, 0, 1, 1], [], []>} : vector<16x16xf32>, vector<16x8xf32>, vector<16x8xf32> -> vector<16x8xf32>
    %168 = vector.extract_strided_slice %85 {offsets = [24, 0], sizes = [8, 32], strides = [1, 1]} : vector<32x32xf32> to vector<8x32xf32>
    %cst_85 = arith.constant dense<0.000000e+00> : vector<16x32xf32>
    %169 = tpu.matmul %167, %168, %cst_85 {dimension_numbers = #tpu.dot_dimension_numbers<[1], [0], [0], [1], [0, 0, 1, 1], [], []>} : vector<16x8xf32>, vector<8x32xf32>, vector<16x32xf32> -> vector<16x32xf32>
    %170 = arith.addf %149, %169 : vector<16x32xf32>
    %c0_86 = arith.constant 0 : index
    %c0_87 = arith.constant 0 : index
    %c0_88 = arith.constant 0 : index
    %171 = vector.load %arg13[%c0_86, %c0_87, %c0_88] : memref<1x6x32xf32, #tpu.memory_space<vmem>>, vector<1x1x32xf32>
    %172 = vector.shape_cast %171 : vector<1x1x32xf32> to vector<1x32xf32>
    %173 = vector.broadcast %172 : vector<1x32xf32> to vector<16x32xf32>
    %174 = arith.addf %170, %173 : vector<16x32xf32>
    %175 = arith.addf %3, %174 : vector<16x32xf32>
    %c0_89 = arith.constant 0 : index
    %c1_90 = arith.constant 1 : index
    %c0_91 = arith.constant 0 : index
    %176 = vector.load %arg13[%c0_89, %c1_90, %c0_91] : memref<1x6x32xf32, #tpu.memory_space<vmem>>, vector<1x1x32xf32>
    %177 = vector.shape_cast %176 : vector<1x1x32xf32> to vector<1x32xf32>
    %c0_92 = arith.constant 0 : index
    %c2_93 = arith.constant 2 : index
    %c0_94 = arith.constant 0 : index
    %178 = vector.load %arg13[%c0_92, %c2_93, %c0_94] : memref<1x6x32xf32, #tpu.memory_space<vmem>>, vector<1x1x32xf32>
    %179 = vector.shape_cast %178 : vector<1x1x32xf32> to vector<1x32xf32>
    %cst_95 = arith.constant dense<0.000000e+00> : vector<16xf32>
    %180 = vector.multi_reduction <add>, %175, %cst_95 [1] : vector<16x32xf32> to vector<16xf32>
    %181 = vector.shape_cast %180 : vector<16xf32> to vector<16x1xf32>
    %cst_96 = arith.constant 3.200000e+01 : f32
    %182 = vector.broadcast %cst_96 : f32 to vector<16x1xf32>
    %183 = arith.divf %181, %182 : vector<16x1xf32>
    %184 = vector.broadcast %183 : vector<16x1xf32> to vector<16x32xf32>
    %185 = arith.subf %175, %184 : vector<16x32xf32>
    %186 = arith.mulf %185, %185 : vector<16x32xf32>
    %cst_97 = arith.constant dense<0.000000e+00> : vector<16xf32>
    %187 = vector.multi_reduction <add>, %186, %cst_97 [1] : vector<16x32xf32> to vector<16xf32>
    %188 = vector.shape_cast %187 : vector<16xf32> to vector<16x1xf32>
    %cst_98 = arith.constant 3.200000e+01 : f32
    %189 = vector.broadcast %cst_98 : f32 to vector<16x1xf32>
    %190 = arith.divf %188, %189 : vector<16x1xf32>
    %cst_99 = arith.constant 9.99999974E-6 : f32
    %191 = vector.broadcast %cst_99 : f32 to vector<16x1xf32>
    %192 = arith.addf %190, %191 : vector<16x1xf32>
    %193 = math.rsqrt %192 : vector<16x1xf32>
    %194 = vector.broadcast %193 : vector<16x1xf32> to vector<16x32xf32>
    %195 = arith.mulf %185, %194 : vector<16x32xf32>
    %196 = vector.broadcast %177 : vector<1x32xf32> to vector<16x32xf32>
    %197 = arith.mulf %195, %196 : vector<16x32xf32>
    %198 = vector.broadcast %179 : vector<1x32xf32> to vector<16x32xf32>
    %199 = arith.addf %197, %198 : vector<16x32xf32>
    %c0_100 = arith.constant 0 : index
    %c0_101 = arith.constant 0 : index
    %c0_102 = arith.constant 0 : index
    %200 = vector.load %arg10[%c0_100, %c0_101, %c0_102] : memref<1x32x32xf32, #tpu.memory_space<vmem>>, vector<1x32x32xf32>
    %201 = vector.shape_cast %200 : vector<1x32x32xf32> to vector<32x32xf32>
    %cst_103 = arith.constant dense<0.000000e+00> : vector<16x32xf32>
    %202 = tpu.matmul %199, %201, %cst_103 {dimension_numbers = #tpu.dot_dimension_numbers<[1], [0], [0], [1], [0, 0, 1, 1], [], []>} : vector<16x32xf32>, vector<32x32xf32>, vector<16x32xf32> -> vector<16x32xf32>
    %c0_104 = arith.constant 0 : index
    %c0_105 = arith.constant 0 : index
    %c0_106 = arith.constant 0 : index
    %203 = vector.load %arg11[%c0_104, %c0_105, %c0_106] : memref<1x1x32xf32, #tpu.memory_space<vmem>>, vector<1x1x32xf32>
    %204 = vector.shape_cast %203 : vector<1x1x32xf32> to vector<1x32xf32>
    %205 = vector.broadcast %204 : vector<1x32xf32> to vector<16x32xf32>
    %206 = arith.addf %202, %205 : vector<16x32xf32>
    %cst_107 = arith.constant 0.000000e+00 : f32
    %207 = vector.broadcast %cst_107 : f32 to vector<16x32xf32>
    %208 = arith.maximumf %206, %207 : vector<16x32xf32>
    %c0_108 = arith.constant 0 : index
    %c0_109 = arith.constant 0 : index
    %c0_110 = arith.constant 0 : index
    %209 = vector.load %arg12[%c0_108, %c0_109, %c0_110] : memref<1x32x32xf32, #tpu.memory_space<vmem>>, vector<1x32x32xf32>
    %210 = vector.shape_cast %209 : vector<1x32x32xf32> to vector<32x32xf32>
    %cst_111 = arith.constant dense<0.000000e+00> : vector<16x32xf32>
    %211 = tpu.matmul %208, %210, %cst_111 {dimension_numbers = #tpu.dot_dimension_numbers<[1], [0], [0], [1], [0, 0, 1, 1], [], []>} : vector<16x32xf32>, vector<32x32xf32>, vector<16x32xf32> -> vector<16x32xf32>
    %c0_112 = arith.constant 0 : index
    %c3_113 = arith.constant 3 : index
    %c0_114 = arith.constant 0 : index
    %212 = vector.load %arg13[%c0_112, %c3_113, %c0_114] : memref<1x6x32xf32, #tpu.memory_space<vmem>>, vector<1x1x32xf32>
    %213 = vector.shape_cast %212 : vector<1x1x32xf32> to vector<1x32xf32>
    %214 = vector.broadcast %213 : vector<1x32xf32> to vector<16x32xf32>
    %215 = arith.addf %211, %214 : vector<16x32xf32>
    %216 = arith.addf %199, %215 : vector<16x32xf32>
    %c0_115 = arith.constant 0 : index
    %c4 = arith.constant 4 : index
    %c0_116 = arith.constant 0 : index
    %217 = vector.load %arg13[%c0_115, %c4, %c0_116] : memref<1x6x32xf32, #tpu.memory_space<vmem>>, vector<1x1x32xf32>
    %218 = vector.shape_cast %217 : vector<1x1x32xf32> to vector<1x32xf32>
    %c0_117 = arith.constant 0 : index
    %c5 = arith.constant 5 : index
    %c0_118 = arith.constant 0 : index
    %219 = vector.load %arg13[%c0_117, %c5, %c0_118] : memref<1x6x32xf32, #tpu.memory_space<vmem>>, vector<1x1x32xf32>
    %220 = vector.shape_cast %219 : vector<1x1x32xf32> to vector<1x32xf32>
    %cst_119 = arith.constant dense<0.000000e+00> : vector<16xf32>
    %221 = vector.multi_reduction <add>, %216, %cst_119 [1] : vector<16x32xf32> to vector<16xf32>
    %222 = vector.shape_cast %221 : vector<16xf32> to vector<16x1xf32>
    %cst_120 = arith.constant 3.200000e+01 : f32
    %223 = vector.broadcast %cst_120 : f32 to vector<16x1xf32>
    %224 = arith.divf %222, %223 : vector<16x1xf32>
    %225 = vector.broadcast %224 : vector<16x1xf32> to vector<16x32xf32>
    %226 = arith.subf %216, %225 : vector<16x32xf32>
    %227 = arith.mulf %226, %226 : vector<16x32xf32>
    %cst_121 = arith.constant dense<0.000000e+00> : vector<16xf32>
    %228 = vector.multi_reduction <add>, %227, %cst_121 [1] : vector<16x32xf32> to vector<16xf32>
    %229 = vector.shape_cast %228 : vector<16xf32> to vector<16x1xf32>
    %cst_122 = arith.constant 3.200000e+01 : f32
    %230 = vector.broadcast %cst_122 : f32 to vector<16x1xf32>
    %231 = arith.divf %229, %230 : vector<16x1xf32>
    %cst_123 = arith.constant 9.99999974E-6 : f32
    %232 = vector.broadcast %cst_123 : f32 to vector<16x1xf32>
    %233 = arith.addf %231, %232 : vector<16x1xf32>
    %234 = math.rsqrt %233 : vector<16x1xf32>
    %235 = vector.broadcast %234 : vector<16x1xf32> to vector<16x32xf32>
    %236 = arith.mulf %226, %235 : vector<16x32xf32>
    %237 = vector.broadcast %218 : vector<1x32xf32> to vector<16x32xf32>
    %238 = arith.mulf %236, %237 : vector<16x32xf32>
    %239 = vector.broadcast %220 : vector<1x32xf32> to vector<16x32xf32>
    %240 = arith.addf %238, %239 : vector<16x32xf32>
    %241 = vector.broadcast %72 : vector<1x1xf32> to vector<16x32xf32>
    %242 = arith.mulf %241, %240 : vector<16x32xf32>
    %cst_124 = arith.constant 1.000000e+00 : f32
    %243 = vector.broadcast %cst_124 : f32 to vector<1x1xf32>
    %244 = arith.subf %243, %72 : vector<1x1xf32>
    %245 = vector.broadcast %244 : vector<1x1xf32> to vector<16x32xf32>
    %246 = arith.mulf %245, %3 : vector<16x32xf32>
    %247 = arith.addf %242, %246 : vector<16x32xf32>
    %c0_125 = arith.constant 0 : index
    %c0_126 = arith.constant 0 : index
    %248 = vector.load %arg18[%c0_125, %c0_126] : memref<16x32xf32, #tpu.memory_space<vmem>>, vector<16x32xf32>
    tpu.vector_store %arg18[%c0_125, %c0_126], %247 {strides = array<i32>} : memref<16x32xf32, #tpu.memory_space<vmem>>, vector<16x32xf32>,
    %c2_i32 = arith.constant 2 : i32
    %249 = arith.cmpi eq, %arg0, %c2_i32 : i32
    %250 = arith.extui %249 : i1 to i32
    %c0_i32_127 = arith.constant 0 : i32
    %251 = arith.cmpi ne, %250, %c0_i32_127 : i32
    scf.if %251 {
      %cst_128 = arith.constant dense<0xFF800000> : vector<32xf32>
      %252 = vector.multi_reduction <maximumf>, %247, %cst_128 [0] : vector<16x32xf32> to vector<32xf32>
      %253 = vector.shape_cast %252 : vector<32xf32> to vector<1x32xf32>
      %c0_129 = arith.constant 0 : index
      %c0_130 = arith.constant 0 : index
      %254 = vector.load %arg14[%c0_129, %c0_130] : memref<32x6xf32, #tpu.memory_space<vmem>>, vector<32x6xf32>
      %cst_131 = arith.constant dense<0.000000e+00> : vector<1x6xf32>
      %255 = tpu.matmul %253, %254, %cst_131 {dimension_numbers = #tpu.dot_dimension_numbers<[1], [0], [0], [1], [0, 0, 1, 1], [], []>} : vector<1x32xf32>, vector<32x6xf32>, vector<1x6xf32> -> vector<1x6xf32>
      %c0_132 = arith.constant 0 : index
      %c0_133 = arith.constant 0 : index
      %256 = vector.load %arg15[%c0_132, %c0_133] : memref<1x6xf32, #tpu.memory_space<vmem>>, vector<1x6xf32>
      %257 = arith.addf %255, %256 : vector<1x6xf32>
      %c0_134 = arith.constant 0 : index
      %c0_135 = arith.constant 0 : index
      %258 = vector.load %arg16[%c0_134, %c0_135] : memref<1x6xf32, #tpu.memory_space<vmem>>, vector<1x6xf32>
      tpu.vector_store %arg16[%c0_134, %c0_135], %257 {strides = array<i32>} : memref<1x6xf32, #tpu.memory_space<vmem>>, vector<1x6xf32>,
    } else {
    }
    return
  }
  func.func @transform_0(%arg0: i32) -> (i32, i32) {
    %c0_i32 = arith.constant 0 : i32
    %c0_i32_0 = arith.constant 0 : i32
    %c0_i32_1 = arith.constant 0 : i32
    return %c0_i32, %c0_i32_0 : i32, i32
  }
  func.func @transform_1(%arg0: i32) -> (i32, i32) {
    %c0_i32 = arith.constant 0 : i32
    %c0_i32_0 = arith.constant 0 : i32
    %c0_i32_1 = arith.constant 0 : i32
    return %c0_i32, %c0_i32_0 : i32, i32
  }
  func.func @transform_2(%arg0: i32) -> (i32, i32) {
    %c0_i32 = arith.constant 0 : i32
    %c0_i32_0 = arith.constant 0 : i32
    %c0_i32_1 = arith.constant 0 : i32
    return %c0_i32, %c0_i32_0 : i32, i32
  }
  func.func @transform_3(%arg0: i32) -> (i32, i32, i32, i32) {
    %c0_i32 = arith.constant 0 : i32
    %c0_i32_0 = arith.constant 0 : i32
    %c0_i32_1 = arith.constant 0 : i32
    %c0_i32_2 = arith.constant 0 : i32
    return %arg0, %c0_i32, %c0_i32_0, %c0_i32_1 : i32, i32, i32, i32
  }
  func.func @transform_4(%arg0: i32) -> (i32, i32, i32) {
    %c0_i32 = arith.constant 0 : i32
    %c0_i32_0 = arith.constant 0 : i32
    %c0_i32_1 = arith.constant 0 : i32
    return %arg0, %c0_i32, %c0_i32_0 : i32, i32, i32
  }
  func.func @transform_5(%arg0: i32) -> (i32, i32, i32) {
    %c0_i32 = arith.constant 0 : i32
    %c0_i32_0 = arith.constant 0 : i32
    %c0_i32_1 = arith.constant 0 : i32
    return %arg0, %c0_i32, %c0_i32_0 : i32, i32, i32
  }
  func.func @transform_6(%arg0: i32) -> (i32, i32, i32) {
    %c0_i32 = arith.constant 0 : i32
    %c0_i32_0 = arith.constant 0 : i32
    %c0_i32_1 = arith.constant 0 : i32
    return %arg0, %c0_i32, %c0_i32_0 : i32, i32, i32
  }
  func.func @transform_7(%arg0: i32) -> (i32, i32, i32) {
    %c0_i32 = arith.constant 0 : i32
    %c0_i32_0 = arith.constant 0 : i32
    %c0_i32_1 = arith.constant 0 : i32
    return %arg0, %c0_i32, %c0_i32_0 : i32, i32, i32
  }
  func.func @transform_8(%arg0: i32) -> (i32, i32, i32) {
    %c0_i32 = arith.constant 0 : i32
    %c0_i32_0 = arith.constant 0 : i32
    %c0_i32_1 = arith.constant 0 : i32
    return %arg0, %c0_i32, %c0_i32_0 : i32, i32, i32
  }
  func.func @transform_9(%arg0: i32) -> (i32, i32, i32) {
    %c0_i32 = arith.constant 0 : i32
    %c0_i32_0 = arith.constant 0 : i32
    %c0_i32_1 = arith.constant 0 : i32
    return %arg0, %c0_i32, %c0_i32_0 : i32, i32, i32
  }
  func.func @transform_10(%arg0: i32) -> (i32, i32, i32) {
    %c0_i32 = arith.constant 0 : i32
    %c0_i32_0 = arith.constant 0 : i32
    %c0_i32_1 = arith.constant 0 : i32
    return %arg0, %c0_i32, %c0_i32_0 : i32, i32, i32
  }
  func.func @transform_11(%arg0: i32) -> (i32, i32, i32) {
    %c0_i32 = arith.constant 0 : i32
    %c0_i32_0 = arith.constant 0 : i32
    %c0_i32_1 = arith.constant 0 : i32
    return %arg0, %c0_i32, %c0_i32_0 : i32, i32, i32
  }
  func.func @transform_12(%arg0: i32) -> (i32, i32, i32) {
    %c0_i32 = arith.constant 0 : i32
    %c0_i32_0 = arith.constant 0 : i32
    %c0_i32_1 = arith.constant 0 : i32
    return %arg0, %c0_i32, %c0_i32_0 : i32, i32, i32
  }
  func.func @transform_13(%arg0: i32) -> (i32, i32) {
    %c0_i32 = arith.constant 0 : i32
    %c0_i32_0 = arith.constant 0 : i32
    %c0_i32_1 = arith.constant 0 : i32
    return %c0_i32, %c0_i32_0 : i32, i32
  }
  func.func @transform_14(%arg0: i32) -> (i32, i32) {
    %c0_i32 = arith.constant 0 : i32
    %c0_i32_0 = arith.constant 0 : i32
    %c0_i32_1 = arith.constant 0 : i32
    return %c0_i32, %c0_i32_0 : i32, i32
  }
  func.func @transform_15(%arg0: i32) -> (i32, i32) {
    %c0_i32 = arith.constant 0 : i32
    %c0_i32_0 = arith.constant 0 : i32
    %c0_i32_1 = arith.constant 0 : i32
    return %c0_i32, %c0_i32_0 : i32, i32
  }
  func.func @transform_16(%arg0: i32) -> (i32, i32, i32) {
    %c0_i32 = arith.constant 0 : i32
    %c0_i32_0 = arith.constant 0 : i32
    %c0_i32_1 = arith.constant 0 : i32
    return %arg0, %c0_i32, %c0_i32_0 : i32, i32, i32
  }
}

</mosaic_0001>

<bundles_post_ra>
// kernel: model_forward.1
= control target key start
LH: loop header
LB: loop body
LE: loop exit
PB: predicated region body
PF: predicated region fallthrough
CT: control target
= control target key end

     0   :  { %s4957_s0 = inlined_call_operand.vmem [shape: f32[16,1], index: 0, kind: input, shape index: {}]   ;;  %s4958_s1 = inlined_call_operand.vmem [shape: f32[5,32], index: 1, kind: input, shape index: {}]   ;;  %s4959_s2 = inlined_call_operand.hbm [shape: f32[32,32], index: 2, kind: input, shape index: {}]   ;;  %s4960_s3 = inlined_call_operand.hbm [shape: f32[3,3,32,32], index: 3, kind: input, shape index: {}]   ;;  %s4961_s4 = inlined_call_operand.vmem [shape: f32[3,4,32], index: 4, kind: input, shape index: {}]   ;;  %s4962_s5 = inlined_call_operand.vmem [shape: f32[3,1,1], index: 5, kind: input, shape index: {}]   ;;  %s4963_s6 = inlined_call_operand.vmem [shape: f32[3,32,96], index: 6, kind: input, shape index: {}]   ;;  %s4964_s7 = inlined_call_operand.hbm [shape: f32[3,1,96], index: 7, kind: input, shape index: {}]   ;;  %s4965_s8 = inlined_call_operand.hbm [shape: f32[3,32,32], index: 8, kind: input, shape index: {}]   ;;  %s4966_s9 = inlined_call_operand.hbm [shape: f32[3,32,32], index: 9, kind: input, shape index: {}]   ;;  %s4967_s10 = inlined_call_operand.hbm [shape: f32[3,1,32], index: 10, kind: input, shape index: {}]   ;;  %s4968_s11 = inlined_call_operand.hbm [shape: f32[3,32,32], index: 11, kind: input, shape index: {}]   ;;  %s4969_s12 = inlined_call_operand.hbm [shape: f32[3,6,32], index: 12, kind: input, shape index: {}]   ;;  %s4970_s13 = inlined_call_operand.vmem [shape: f32[32,6], index: 13, kind: input, shape index: {}]   ;;  %s4971_s14 = inlined_call_operand.vmem [shape: f32[1,6], index: 14, kind: input, shape index: {}]   ;;  %s4972_s15 = inlined_call_operand.hbm [shape: f32[1,6], index: 15, kind: output, shape index: {0}]   ;;  %s4973_s16 = inlined_call_operand.vmem [shape: f32[3,1,2], index: 16, kind: output, shape index: {1}]  }
   0x1   :  { %4997 = sst [smem:[#allocation27_spill]] %s4957_s0 }
   0x2   :  { %4998 = sst [smem:[#allocation28_spill]] %s4958_s1 }
   0x3   :  { %4999 = sst [smem:[#allocation29_spill]] %s4959_s2 }
   0x4   :  { %5000 = sst [smem:[#allocation30_spill]] %s4960_s3 }
   0x5   :  { %5001 = sst [smem:[#allocation31_spill]] %s4961_s4 }
   0x6   :  { %5002 = sst [smem:[#allocation32_spill]] %s4963_s6 }
   0x7   :  { %5003 = sst [smem:[#allocation33_spill]] %s4964_s7 }
   0x8   :  { %5004 = sst [smem:[#allocation34_spill]] %s4965_s8 }
   0x9   :  { %5005 = sst [smem:[#allocation35_spill]] %s4967_s10 }
   0xa   :  { %5006 = sst [smem:[#allocation36_spill]] %s4970_s13 }
   0xb   :  { %5007 = sst [smem:[#allocation37_spill]] %s4971_s14 }
   0xc   :  { %5008 = sst [smem:[#allocation38_spill]] %s4972_s15 }
   0xd   :  { %5009 = sst [smem:[#allocation39_spill]] %s4973_s16 }
   0xe   :  { %22 = vsyncpa [#allocation4], 0 }
   0xf   :  { %23 = vsyncpa [#allocation7], 0 }
  0x10   :  { %25 = vsyncpa [#allocation7 + $0x1], 0 }
  0x11   :  { %26 = vsyncpa [#allocation10], 0 }
  0x12   :  { %28 = vsyncpa [#allocation10 + $0x1], 0 }
  0x13   :  { %29 = vsyncpa [#allocation13], 0 }
  0x14   :  { %31 = vsyncpa [#allocation13 + $0x1], 0 }
  0x15   :  { %32 = vsyncpa [#allocation16], 0 }
  0x16   :  { %34 = vsyncpa [#allocation16 + $0x1], 0 }
  0x17   :  { %35 = vsyncpa [#allocation5], 0  ;;  %s4275_s21 = smov 0   ;;  %s4277_s22 = smov 0  }
  0x18   :  { %s4279_s23 = smov 0   ;;  %s4281_s24 = smov 0  }
  0x19 LB: > { %5010 = sst [smem:[#allocation24_spill]] %s4154_s23  ;;  %s4296_s25 = sadd.s32 1, %s4158_s24   ;;  %s4158_s24 = sphi %s4281_s24, %s5054_s24   ;;  %s4154_s23 = sphi %s4279_s23, %s5056_s23   ;;  %s4150_s22 = sphi %s4277_s22, %s5058_s22   ;;  %s4146_s21 = sphi %s4275_s21, %s5057_s21  }
  0x1a   : > { %5011 = sst [smem:[#allocation25_spill]] %s4296_s25  ;;  %s111_s26 = sadd.s32 1, %s4154_s23 }
  0x1b   : > { %s108_s27 = ssub.s32 %s4158_s24, %s4296_s25  ;;  %p118_p0 = scmp.ne.s32.totalorder %s4154_s23, %s4150_s22 }
  0x1c   : > { %p109_p1 = scmp.eq.s32.totalorder %s108_s27, 0  ;;  %p119_p2 = scmp.eq.s32.totalorder %s4158_s24, 0 }
  0x1d   : > { %p3690_p4 = scmp.lt.s32.totalorder %s4158_s24, 3  ;;  %s4309_s29 = sand.u32 1, %s4158_s24  }
  0x1e   : > { %s4305_s28 = scalar_select %p109_p1, %s4154_s23, %s111_s26  }
  0x1f   : > { %p120_p3 = por %p119_p2, %p118_p0  ;;  %s4312_s30 = sand.u32 1, %s4154_s23  }
  0x20   : > { %5012 = sst [smem:[#allocation26_spill]] %s4305_s28  ;;  %s3634_s0 = smul.u32 96, %s4312_s30 }
  0x21   : > { %p4315_p5 = pnand %p3690_p4, %p120_p3  ;;  %s3635_s18 = smul.u32 1536, %s4158_s24 }
  0x22   : > { %s5014_s3 = sld [smem:[#allocation30_spill]]  ;;  %s500_s27 = scalar_lea.vmem [#allocation6], %s3634_s0 }
  0x23   : > { %s5013_s17 = scalar_select %p4315_p5, 1, 0 }
  0x24   : > { %s507_s28 = sshll.u32 %s500_s27, 4  ;;  %s4328_s23 = sshll.u32 %s4312_s30, 5  ;;  %s4325_s28 = int_to_ptr.vmem [resolvable:$true] %s507_s28 }
  0x25   : > { %p4335_p7 = pneg %p4315_p5 }
  0x27   : > { %s5015_s14 = scalar_select %p4335_p7, 1, 0 }
  0x28   : > { %s4323_s26 = scalar_lea.hbm %s5014_s3, %s3635_s18  ;;  %s3845_s0 = scalar_lea.hbm %s5014_s3, 4608 }
  0x29   : > { %s3840_s15 = scalar_lea.hbm %s4323_s26, 1536  ;;  %p3846_p10 = scmp.lt.u32.totalorder %s4323_s26, %s5014_s3 }
  0x2a   : > { %p3841_p6 = scmp.ne.s32.totalorder %s4323_s26, %s3840_s15  ;;  %p3847_p11 = scmp.lt.u32.totalorder %s3845_s0, %s3840_s15 }
  0x2b   : > { %p3849_p13 = scmp.lt.u32.totalorder %s3840_s15, %s4323_s26 }
  0x2c   : > { %p3843_p8 = pnand %p4335_p7, %p3841_p6  ;;  %p3848_p12 = por %p3847_p11, %p3846_p10 }
  0x2e   : > { %p3844_p9 = pneg %p3843_p8  ;;  %p3850_p0 = por %p3849_p13, %p3848_p12 }
  0x30   : > { %p3851_p1 = pnand %p3850_p0, %p3844_p9 }
  0x32   : > { %3854 = shalt.err (!%p3851_p1)
}
  0x33   : > { %s3855_s25 = scalar_lea.vmem %s4325_s28, 1536  ;;  %s4160_s18 = smov [#allocation6]  }
  0x34   : > { %p3856_p2 = scmp.ne.s32.totalorder %s4325_s28, %s3855_s25  ;;  %s3860_s19 = sshll.u32 %s4160_s18, 4  ;;  %s3861_s19 = int_to_ptr.vmem [resolvable:$false] %s3860_s19 }
  0x35   : > { %s3862_s20 = scalar_lea.vmem %s3861_s19, 3072  ;;  %p3863_p6 = scmp.lt.s32.totalorder %s4325_s28, %s3861_s19 }
  0x36   : > { %p3858_p3 = pnand %p3856_p2, %p4335_p7  ;;  %p3864_p8 = scmp.lt.s32.totalorder %s3862_s20, %s3855_s25 }
  0x38   : > { %p3859_p4 = pneg %p3858_p3  ;;  %p3865_p10 = por %p3864_p8, %p3863_p6 }
  0x3a   : > { %p3866_p11 = pnand %p3865_p10, %p3859_p4 }
  0x3c   : > { %3869 = shalt.err (!%p3866_p11)
}
  0x3d   : > { %s4982_s15 = smov 128   ;;  %s4987_s0 = smov 8  }
  0x3e   : > { %s5016_s27 = scalar_lea.sflag [#allocation7], %s4309_s29  ;;  %s4364_s25 = sshll.u32 %s4158_s24, 9 }
  0x3f   : > { %3670 = dma.hbm_to_vmem [thread:$0]  (!%p4315_p5), %s4323_s26, 1536, %s4325_s28, %s5016_s27, %s4982_s15, %s4982_s15, %s4987_s0  }
  0x40   : > { %s5017_s8 = sld [smem:[#allocation34_spill]]  ;;  %s559_s3 = scalar_lea.vmem [#allocation9], %s4328_s23 }
  0x41   : > { %s566_s13 = sshll.u32 %s559_s3, 4  ;;  %s3180_s1 = sshll.u32 %s4158_s24, 4  ;;  %s4373_s13 = int_to_ptr.vmem [resolvable:$true] %s566_s13 }
  0x42   : > { %s4981_s16 = scalar_lea.sflag [#allocation10], %s4309_s29 }
  0x46   : > { %s4370_s20 = scalar_lea.hbm %s5017_s8, %s4364_s25  ;;  %s3875_s27 = scalar_lea.hbm %s5017_s8, 1536 }
  0x47   : > { %s3870_s6 = scalar_lea.hbm %s4370_s20, 512  ;;  %p3876_p0 = scmp.lt.u32.totalorder %s4370_s20, %s5017_s8 }
  0x48   : > { %p3871_p9 = scmp.ne.s32.totalorder %s4370_s20, %s3870_s6  ;;  %p3877_p1 = scmp.lt.u32.totalorder %s3875_s27, %s3870_s6 }
  0x49   : > { %p3879_p3 = scmp.lt.u32.totalorder %s3870_s6, %s4370_s20 }
  0x4a   : > { %p3873_p12 = pnand %p3871_p9, %p4335_p7  ;;  %p3878_p2 = por %p3877_p1, %p3876_p0 }
  0x4c   : > { %p3874_p13 = pneg %p3873_p12  ;;  %p3880_p4 = por %p3879_p3, %p3878_p2 }
  0x4e   : > { %p3881_p6 = pnand %p3880_p4, %p3874_p13 }
  0x50   : > { %3884 = shalt.err (!%p3881_p6)
}
  0x51   : > { %s3885_s3 = scalar_lea.vmem %s4373_s13, 512  ;;  %s4163_s28 = smov [#allocation9]  }
  0x52   : > { %p3886_p8 = scmp.ne.s32.totalorder %s4373_s13, %s3885_s3  ;;  %s3890_s26 = sshll.u32 %s4163_s28, 4  ;;  %s3891_s26 = int_to_ptr.vmem [resolvable:$false] %s3890_s26 }
  0x53   : > { %s3892_s18 = scalar_lea.vmem %s3891_s26, 1024  ;;  %p3893_p9 = scmp.lt.s32.totalorder %s4373_s13, %s3891_s26 }
  0x54   : > { %p3888_p10 = pnand %p3886_p8, %p4335_p7  ;;  %p3894_p12 = scmp.lt.s32.totalorder %s3892_s18, %s3885_s3 }
  0x56   : > { %p3889_p11 = pneg %p3888_p10  ;;  %p3895_p0 = por %p3894_p12, %p3893_p9 }
  0x58   : > { %p3896_p1 = pnand %p3895_p0, %p3889_p11 }
  0x5a   : > { %3899 = shalt.err (!%p3896_p1)
}
  0x5b   : > { %3676 = dma.hbm_to_vmem [thread:$0]  (!%p4315_p5), %s4370_s20, 512, %s4373_s13, %s4981_s16, %s4982_s15, %s4982_s15, %s4987_s0  }
  0x5c   : > { %s5018_s7 = sld [smem:[#allocation33_spill]]  ;;  %s5019_s10 = sld [smem:[#allocation35_spill]] }
  0x5d   : > { %s600_s18 = scalar_lea.vmem [#allocation12], %s4312_s30  ;;  %s4986_s13 = scalar_lea.sflag [#allocation13], %s4309_s29 }
  0x5e   : > { %s607_s8 = sshll.u32 %s600_s18, 4  ;;  %s608_s8 = int_to_ptr.vmem [resolvable:$true] %s607_s8 }
  0x62   : > { %s4408_s19 = scalar_lea.hbm %s5018_s7, %s3180_s1  ;;  %s4415_s26 = scalar_lea.hbm %s5019_s10, %s3180_s1 }
  0x63   : > { %s3900_s20 = scalar_lea.hbm %s4415_s26, 16  ;;  %s3905_s16 = scalar_lea.hbm %s5019_s10, 48 }
  0x64   : > { %p3901_p13 = scmp.ne.s32.totalorder %s4415_s26, %s3900_s20  ;;  %p3906_p4 = scmp.lt.u32.totalorder %s4415_s26, %s5019_s10 }
  0x65   : > { %p3907_p6 = scmp.lt.u32.totalorder %s3905_s16, %s3900_s20  ;;  %p3909_p10 = scmp.lt.u32.totalorder %s3900_s20, %s4415_s26 }
  0x66   : > { %p3903_p2 = pnand %p3901_p13, %p4335_p7 }
  0x67   : > { %p3908_p8 = por %p3907_p6, %p3906_p4 }
  0x68   : > { %p3904_p3 = pneg %p3903_p2 }
  0x69   : > { %p3910_p11 = por %p3909_p10, %p3908_p8 }
  0x6b   : > { %p3911_p9 = pnand %p3910_p11, %p3904_p3 }
  0x6d   : > { %3914 = shalt.err (!%p3911_p9)
}
  0x6e   : > { %s3915_s28 = scalar_lea.vmem %s608_s8, 16  ;;  %s4164_s18 = smov [#allocation12]  }
  0x6f   : > { %p3916_p12 = scmp.ne.s32.totalorder %s608_s8, %s3915_s28  ;;  %s3920_s15 = sshll.u32 %s4164_s18, 4  ;;  %s3921_s15 = int_to_ptr.vmem [resolvable:$false] %s3920_s15 }
  0x70   : > { %s3922_s6 = scalar_lea.vmem %s3921_s15, 32  ;;  %p3923_p13 = scmp.lt.s32.totalorder %s608_s8, %s3921_s15 }
  0x71   : > { %p3918_p0 = pnand %p3916_p12, %p4335_p7  ;;  %p3924_p2 = scmp.lt.s32.totalorder %s3922_s6, %s3915_s28 }
  0x73   : > { %p3919_p1 = pneg %p3918_p0  ;;  %p3925_p5 = por %p3924_p2, %p3923_p13 }
  0x75   : > { %p3926_p4 = pnand %p3925_p5, %p3919_p1 }
  0x77   : > { %3929 = shalt.err (!%p3926_p4)
}
  0x78   : > { %p5020_p6 = scmp.ne.s32.totalorder %s5013_s17, 0  ;;  %s4439_s16 = sadd.s32 4294967295, %s4158_s24  }
  0x79   : > { %p124_p5 = scmp.ne.s32.totalorder %s4150_s22, %s4146_s21  ;;  %p4989_p3 = scmp.eq.s32.totalorder %s4439_s16, 0 }
  0x7a   : > { %3682 = dma.hbm_to_vmem [thread:$0]  (!%p5020_p6), %s4415_s26, 16, %s608_s8, %s4986_s13  }
  0x7b   : > { %p3176_p8 = scmp.ge.s32.totalorder %s4158_s24, 1  ;;  %p458_p10 = scmp.lt.s32.totalorder %s4158_s24, 4 }
  0x7c   : > { %p4449_p9 = por %p4989_p3, %p124_p5  ;;  %s4165_s26 = smov [#allocation3]  }
  0x7d   : > { %p4453_p12 = pnand %p3176_p8, %p458_p10  ;;  %s476_s21 = sshll.u32 %s4165_s26, 4  ;;  %s4457_s21 = int_to_ptr.vmem [resolvable:$true] %s476_s21 }
  0x7e   : > { %s5021_s15 = scalar_select %p4449_p9, 1, 0 }
  0x7f   : > { %s5022_s8 = scalar_select %p4453_p12, 1, 0 }
  0x80   : > { %p3663_p0 = pneg %p4453_p12  ;;  %s541_s20 = scalar_lea.vmem [#allocation8], %s4312_s30 }
  0x81   : > { %s548_s27 = sshll.u32 %s541_s20, 4  ;;  %s4474_s18 = scalar_lea.hbm %s4966_s9, %s4364_s25  ;;  %s4462_s27 = int_to_ptr.vmem [resolvable:$true] %s548_s27 }
  0x82   : > { %p4466_p1 = pnand %p3663_p0, %p4989_p3  ;;  %s3930_s6 = scalar_lea.hbm %s4408_s19, 16 }
  0x83   : > { %p3931_p13 = scmp.ne.s32.totalorder %s4408_s19, %s3930_s6  ;;  %s3935_s20 = scalar_lea.hbm %s5018_s7, 48 }
  0x84   : > { %s5023_s3 = scalar_select %p4466_p1, 1, 0 }
  0x85   : > { %p3933_p2 = pnand %p3931_p13, %p4335_p7  ;;  %p3936_p5 = scmp.lt.u32.totalorder %s4408_s19, %s5018_s7 }
  0x86   : > { %p3937_p8 = scmp.lt.u32.totalorder %s3935_s20, %s3930_s6  ;;  %p3939_p0 = scmp.lt.u32.totalorder %s3930_s6, %s4408_s19 }
  0x87   : > { %p3934_p4 = pneg %p3933_p2 }
  0x88   : > { %p3938_p10 = por %p3937_p8, %p3936_p5 }
  0x8a   : > { %p3940_p11 = por %p3939_p0, %p3938_p10 }
  0x8c   : > { %p3941_p3 = pnand %p3940_p11, %p3934_p4 }
  0x8e   : > { %3944 = shalt.err (!%p3941_p3)
}
  0x8f   : > { %s3945_s1 = scalar_lea.vmem %s4462_s27, 16  ;;  %s4166_s13 = smov [#allocation8]  }
  0x90   : > { %p3946_p13 = scmp.ne.s32.totalorder %s4462_s27, %s3945_s1  ;;  %s3950_s28 = sshll.u32 %s4166_s13, 4  ;;  %s3951_s28 = int_to_ptr.vmem [resolvable:$false] %s3950_s28 }
  0x91   : > { %s3952_s10 = scalar_lea.vmem %s3951_s28, 32  ;;  %p3953_p12 = scmp.lt.s32.totalorder %s4462_s27, %s3951_s28 }
  0x92   : > { %p3948_p2 = pnand %p3946_p13, %p4335_p7  ;;  %p3954_p1 = scmp.lt.s32.totalorder %s3952_s10, %s3945_s1 }
  0x94   : > { %p3949_p9 = pneg %p3948_p2  ;;  %p3955_p5 = por %p3954_p1, %p3953_p12 }
  0x96   : > { %p3956_p8 = pnand %p3955_p5, %p3949_p9 }
  0x98   : > { %3959 = shalt.err (!%p3956_p8)
}
  0x99   : > { %s5024_s0 = scalar_lea.sflag [#allocation7], %s4309_s29  ;;  %s580_s6 = scalar_lea.vmem [#allocation11], %s4328_s23 }
  0x9a   : > { %3673 = dma.hbm_to_vmem [thread:$0]  (!%p5020_p6), %s4408_s19, 16, %s4462_s27, %s5024_s0  }
  0x9b   : > { %s587_s26 = sshll.u32 %s580_s6, 4  ;;  %s5025_s2 = sld [smem:[#allocation29_spill]]  ;;  %s4524_s26 = int_to_ptr.vmem [resolvable:$true] %s587_s26 }
  0x9c   : > { %p5026_p11 = scmp.ne.s32.totalorder %s5023_s3, 0 }
  0x9e   : > { %p3962_p9 = pneg %p5026_p11 }
  0xa1   : > { %s3960_s7 = scalar_lea.hbm %s5025_s2, 512 }
  0xa2   : > { %p3961_p3 = scmp.ne.s32.totalorder %s5025_s2, %s3960_s7  ;;  %p3967_p4 = scmp.lt.u32.totalorder %s3960_s7, %s5025_s2 }
  0xa4   : > { %p3963_p12 = pnand %p3962_p9, %p3961_p3 }
  0xa6   : > { %p3964_p1 = pneg %p3963_p12 }
  0xa8   : > { %p3969_p10 = pnand %p3967_p4, %p3964_p1 }
  0xaa   : > { %3972 = shalt.err (!%p3969_p10)
}
  0xab   : > { %s3973_s19 = scalar_lea.vmem %s4457_s21, 512  ;;  %p3981_p5 = scmp.lt.s32.totalorder %s4457_s21, %s4457_s21 }
  0xac   : > { %p3974_p0 = scmp.ne.s32.totalorder %s4457_s21, %s3973_s19  ;;  %p3982_p8 = scmp.lt.s32.totalorder %s3973_s19, %s3973_s19 }
  0xae   : > { %p3976_p13 = pnand %p3974_p0, %p3962_p9  ;;  %p3983_p6 = por %p3982_p8, %p3981_p5 }
  0xb0   : > { %p3977_p2 = pneg %p3976_p13 }
  0xb2   : > { %p3984_p7 = pnand %p3983_p6, %p3977_p2 }
  0xb4   : > { %3987 = shalt.err (!%p3984_p7)
}
  0xb5   : > { %s5027_s27 = smov 8   ;;  %s5028_s4 = smov 128  }
  0xb6   : > { %3666 = dma.hbm_to_vmem [thread:$0]  (!%p5026_p11), %s5025_s2, 512, %s4457_s21, [#allocation4], %s5028_s4, %s5028_s4, %s5027_s27  }
  0xb7   : > { %s3988_s6 = scalar_lea.hbm %s4474_s18, 512  ;;  %p5029_p7 = scmp.ne.s32.totalorder %s5015_s14, 0 }
  0xb8   : > { %p3989_p6 = scmp.ne.s32.totalorder %s4474_s18, %s3988_s6  ;;  %s3993_s13 = scalar_lea.hbm %s4966_s9, 1536 }
  0xb9   : > { %p3994_p12 = scmp.lt.u32.totalorder %s4474_s18, %s4966_s9  ;;  %p3995_p1 = scmp.lt.u32.totalorder %s3993_s13, %s3988_s6 }
  0xba   : > { %p3991_p3 = pnand %p3989_p6, %p5029_p7  ;;  %p3997_p10 = scmp.lt.u32.totalorder %s3988_s6, %s4474_s18 }
  0xbb   : > { %p3996_p4 = por %p3995_p1, %p3994_p12 }
  0xbc   : > { %p3992_p9 = pneg %p3991_p3 }
  0xbd   : > { %p3998_p0 = por %p3997_p10, %p3996_p4 }
  0xbf   : > { %p3999_p11 = pnand %p3998_p0, %p3992_p9 }
  0xc1   : > { %4002 = shalt.err (!%p3999_p11)
}
  0xc2   : > { %s4003_s21 = scalar_lea.vmem %s4524_s26, 512  ;;  %s4167_s10 = smov [#allocation11]  }
  0xc3   : > { %p4004_p13 = scmp.ne.s32.totalorder %s4524_s26, %s4003_s21  ;;  %s4008_s19 = sshll.u32 %s4167_s10, 4  ;;  %s4009_s19 = int_to_ptr.vmem [resolvable:$false] %s4008_s19 }
  0xc4   : > { %s4010_s7 = scalar_lea.vmem %s4009_s19, 1024  ;;  %p4011_p8 = scmp.lt.s32.totalorder %s4524_s26, %s4009_s19 }
  0xc5   : > { %p4006_p2 = pnand %p4004_p13, %p5029_p7  ;;  %p4012_p6 = scmp.lt.s32.totalorder %s4010_s7, %s4003_s21 }
  0xc7   : > { %p4007_p5 = pneg %p4006_p2  ;;  %p4013_p3 = por %p4012_p6, %p4011_p8 }
  0xc9   : > { %p4014_p12 = pnand %p4013_p3, %p4007_p5 }
  0xcb   : > { %4017 = shalt.err (!%p4014_p12)
}
  0xcc   : > { %p5030_p9 = scmp.ne.s32.totalorder %s5013_s17, 0  ;;  %s5031_s0 = scalar_lea.sflag [#allocation10], %s4309_s29 }
  0xcd   : > { %s4556_s20 = scalar_lea.hbm %s4968_s11, %s4364_s25  ;;  %s618_s13 = scalar_lea.vmem [#allocation14], %s4328_s23 }
  0xce   : > { %3679 = dma.hbm_to_vmem [thread:$0]  (!%p5030_p9), %s4474_s18, 512, %s4524_s26, %s5031_s0, %s5028_s4, %s5028_s4, %s5027_s27  }
  0xcf   : > { %s625_s28 = sshll.u32 %s618_s13, 4  ;;  %s4018_s1 = scalar_lea.hbm %s4556_s20, 512  ;;  %s4559_s28 = int_to_ptr.vmem [resolvable:$true] %s625_s28 }
  0xd0   : > { %p4019_p1 = scmp.ne.s32.totalorder %s4556_s20, %s4018_s1  ;;  %s4023_s26 = scalar_lea.hbm %s4968_s11, 1536 }
  0xd1   : > { %p4024_p0 = scmp.lt.u32.totalorder %s4556_s20, %s4968_s11  ;;  %p4025_p11 = scmp.lt.u32.totalorder %s4023_s26, %s4018_s1 }
  0xd2   : > { %p4021_p4 = pnand %p4019_p1, %p5029_p7  ;;  %p4027_p2 = scmp.lt.u32.totalorder %s4018_s1, %s4556_s20 }
  0xd3   : > { %p4026_p13 = por %p4025_p11, %p4024_p0 }
  0xd4   : > { %p4022_p10 = pneg %p4021_p4 }
  0xd5   : > { %p4028_p5 = por %p4027_p2, %p4026_p13 }
  0xd7   : > { %p4029_p8 = pnand %p4028_p5, %p4022_p10 }
  0xd9   : > { %4032 = shalt.err (!%p4029_p8)
}
  0xda   : > { %s4033_s23 = scalar_lea.vmem %s4559_s28, 512  ;;  %s4168_s19 = smov [#allocation14]  }
  0xdb   : > { %p4034_p6 = scmp.ne.s32.totalorder %s4559_s28, %s4033_s23  ;;  %s4038_s7 = sshll.u32 %s4168_s19, 4  ;;  %s4039_s7 = int_to_ptr.vmem [resolvable:$false] %s4038_s7 }
  0xdc   : > { %s4040_s0 = scalar_lea.vmem %s4039_s7, 1024  ;;  %p4041_p1 = scmp.lt.s32.totalorder %s4559_s28, %s4039_s7 }
  0xdd   : > { %p4036_p3 = pnand %p4034_p6, %p5029_p7  ;;  %p4042_p4 = scmp.lt.s32.totalorder %s4040_s0, %s4033_s23 }
  0xdf   : > { %p4037_p12 = pneg %p4036_p3  ;;  %p4043_p0 = por %p4042_p4, %p4041_p1 }
  0xe1   : > { %p4044_p11 = pnand %p4043_p0, %p4037_p12 }
  0xe3   : > { %4047 = shalt.err (!%p4044_p11)
}
  0xe4   : > { %s5032_s6 = scalar_lea.sflag [#allocation13], %s4309_s29  ;;  %s3191_s3 = sshll.u32 %s4312_s30, 3 }
  0xe5   : > { %3685 = dma.hbm_to_vmem [thread:$0]  (!%p5030_p9), %s4556_s20, 512, %s4559_s28, %s5032_s6, %s5028_s4, %s5028_s4, %s5027_s27  }
  0xe6   : > { %s3192_s13 = sshll.u32 %s4158_s24, 7  ;;  %s639_s26 = scalar_lea.vmem [#allocation15], %s3191_s3 }
  0xe7   : > { %s4592_s18 = scalar_lea.hbm %s4969_s12, %s3192_s13  ;;  %s646_s29 = sshll.u32 %s639_s26, 4  ;;  %s647_s29 = int_to_ptr.vmem [resolvable:$true] %s646_s29 }
  0xe8   : > { %s636_s10 = scalar_lea.sflag [#allocation16], %s4312_s30  ;;  %s4048_s25 = scalar_lea.hbm %s4592_s18, 128 }
  0xe9   : > { %p4049_p10 = scmp.ne.s32.totalorder %s4592_s18, %s4048_s25  ;;  %s4053_s4 = scalar_lea.hbm %s4969_s12, 384 }
  0xea   : > { %p4054_p5 = scmp.lt.u32.totalorder %s4592_s18, %s4969_s12  ;;  %p4055_p8 = scmp.lt.u32.totalorder %s4053_s4, %s4048_s25 }
  0xeb   : > { %p4051_p13 = pnand %p4049_p10, %p5029_p7  ;;  %p4057_p3 = scmp.lt.u32.totalorder %s4048_s25, %s4592_s18 }
  0xec   : > { %p4056_p6 = por %p4055_p8, %p4054_p5 }
  0xed   : > { %p4052_p2 = pneg %p4051_p13 }
  0xee   : > { %p4058_p12 = por %p4057_p3, %p4056_p6 }
  0xf0   : > { %p4059_p1 = pnand %p4058_p12, %p4052_p2 }
  0xf2   : > { %4062 = shalt.err (!%p4059_p1)
}
  0xf3   : > { %s4063_s30 = scalar_lea.vmem %s647_s29, 128  ;;  %s4169_s23 = smov [#allocation15]  }
  0xf4   : > { %p4064_p4 = scmp.ne.s32.totalorder %s647_s29, %s4063_s30  ;;  %s4068_s19 = sshll.u32 %s4169_s23, 4  ;;  %s4069_s19 = int_to_ptr.vmem [resolvable:$false] %s4068_s19 }
  0xf5   : > { %s4070_s7 = scalar_lea.vmem %s4069_s19, 256  ;;  %p4071_p10 = scmp.lt.s32.totalorder %s647_s29, %s4069_s19 }
  0xf6   : > { %p4066_p0 = pnand %p4064_p4, %p5029_p7  ;;  %p4072_p13 = scmp.lt.s32.totalorder %s4070_s7, %s4063_s30 }
  0xf8   : > { %p4067_p11 = pneg %p4066_p0  ;;  %p4073_p9 = por %p4072_p13, %p4071_p10 }
  0xfa   : > { %p4074_p5 = pnand %p4073_p9, %p4067_p11 }
  0xfc   : > { %4077 = shalt.err (!%p4074_p5)
}
  0xfd   : > { %p5033_p8 = scmp.ne.s32.totalorder %s5013_s17, 0  ;;  %p5034_p2 = scmp.ne.s32.totalorder %s5022_s8, 0 }
  0xfe   : > { %p5035_p6 = scmp.eq.s32.totalorder (!%p5034_p2), %s4439_s16, 0 }
  0xff   : > { %3688 = dma.hbm_to_vmem [thread:$0]  (!%p5033_p8), %s4592_s18, 128, %s647_s29, %s636_s10  }
 0x100   : > { %655 = sbr.rel (%p5034_p2) target bundleno = 4923 (0x133b), region = 80 }
 0x107   : > { %4121 = dma.done.wait (%p5035_p6), [#allocation4], 512   ;;  %p5036_p7 = pmov %p5035_p6 }
 0x108   : > { %s661_s14 = sand.u32 1, %s4439_s16   ;;  %s4620_s0 = sand.u32 1, %s4150_s22  }
 0x109   : > { %4123 = vsyncadd (%p5036_p7), [#allocation4], 4294966784  ;;  %s3636_s6 = smul.u32 96, %s4620_s0  ;;  %s662_s17 = scalar_lea.sflag [#allocation7], %s661_s14 }
 0x10a   : > { %p5037_p9 = scmp.ne.s32.totalorder %s5021_s15, 0 }
 0x10b   : > { %s4623_s3 = scalar_lea.vmem [#allocation6], %s3636_s6 }
 0x10c   : > { %4125 = dma.done.wait (%p5037_p9), %s662_s17, 1552  }
 0x10d   : > { %4127 = vsyncadd (%p5037_p9), %s662_s17, 4294965744  ;;  %s3195_s8 = sshll.u32 %s4620_s0, 5  ;;  %s679_s1 = scalar_lea.sflag [#allocation10], %s661_s14 }
 0x10e   : > { %s4631_s21 = scalar_lea.vmem [#allocation9], %s3195_s8 }
 0x10f   : > { %4129 = dma.done.wait (%p5037_p9), %s679_s1, 1024  }
 0x110   : > { %4131 = vsyncadd (%p5037_p9), %s679_s1, 4294966272  ;;  %s4637_s18 = scalar_lea.vmem [#allocation11], %s3195_s8  ;;  %s697_s26 = scalar_lea.sflag [#allocation13], %s661_s14 }
 0x111   : > { %4133 = dma.done.wait (%p5037_p9), %s697_s26, 528  }
 0x112   : > { %4135 = vsyncadd (%p5037_p9), %s697_s26, 4294966768  ;;  %s3198_s10 = sshll.u32 %s4620_s0, 3  ;;  %s4645_s25 = scalar_lea.vmem [#allocation14], %s3195_s8 }
 0x113   : > { %s714_s27 = scalar_lea.sflag [#allocation16], %s4620_s0  ;;  %s4648_s24 = scalar_lea.vmem [#allocation15], %s3198_s10 }
 0x114   : > { %4137 = dma.done.wait (%p5037_p9), %s714_s27, 128  }
 0x115   : > { %4139 = vsyncadd (%p5037_p9), %s714_s27, 4294967168  ;;  %p804_p3 = scmp.lt.s32.totalorder %s4439_s16, 2  ;;  %s5038_s14 = sld [smem:[#allocation31_spill]] }
 0x116   : > { %s5039_s1 = sld [smem:[#allocation32_spill]]  ;;  %s5040_s29 = sld [smem:[#allocation39_spill]] }
 0x117   : > { %s4656_s4 = scalar_select %p804_p3, %s4439_s16, 2 }
 0x118   : > { %p5041_p12 = scmp.ne.s32.totalorder %s4439_s16, 0 }
 0x119   : > { %s3199_s20 = sshll.u32 %s4656_s4, 2  ;;  %s3279_s15 = sshll.u32 %s4656_s4, 5  ;;  %v4170_v2 = vmov (!%p5041_p12), 0   ;;  %v853_v4 = vld [vmem:[#allocation3] sm:$0xff] (!%p5041_p12)  ;;  %v854_v5 = vld [vmem:[#allocation3 + $0x8] sm:$0xff] (!%p5041_p12)  ;;  %v855_v8 = vld [vmem:[#allocation3 + $0x10] sm:$0xff] (!%p5041_p12) }
 0x11a   : > { %822 = sbr.rel (%p5041_p12) target bundleno = 962 (0x3c2), region = 116  ;;  %s5042_s23 = sld [smem:[#allocation27_spill]] (!%p5041_p12)  ;;  %3749 = vset.pattern.permute.xlu0 (!%p5041_p12), %v4170_v2  ;;  %v3532_v7 = vpack.c.bf16 (!%p5041_p12), %v854_v5, %v853_v4  ;;  %v856_v9 = vld [vmem:[#allocation3 + $0x18] sm:$0xff] (!%p5041_p12)  ;;  %vm862_vm0 = vcmask (!%p5041_p12), 261120  }
 0x11b   : > { %s4666_s6 = scalar_lea.vmem %s5038_s14, %s3199_s20  ;;  %v3536_v10 = vpack.c.bf16 (!%p5041_p12), %v856_v9, %v855_v8  ;;  %s5044_s7 = sld [smem:[#allocation28_spill]] (!%p5041_p12) }
 0x11c   : > { %s4672_s26 = scalar_lea.vmem %s5039_s1, %s3279_s15  ;;  %s818_s13 = scalar_lea.vmem %s5040_s29, %s4656_s4  ;;  %3533 = vmatprep.subr.bf16.mxu0 (!%p5041_p12), %v3532_v7 }
 0x11d   : > { %3535 = vmatpush3.bf16.msra.mxu0 (!%p5041_p12), %v3532_v7 }
 0x11e   : > { %3537 = vmatprep.subr.bf16.mxu0 (!%p5041_p12), %v3536_v10 }
 0x120   : > { %s5043_s2 = smov (!%p5041_p12), %s5042_s23  ;;  %v823_v0 = vld [vmem:[%s5042_s23] sm:$0xff] (!%p5041_p12) }
 0x121   : > { %v824_v1 = vld [vmem:[%s5043_s2 + $0x8] sm:$0xff]  ;;  %v825_v3 = vmin.f32 %v823_v0, 10.0  ;;  %3539 = vmatpush3.bf16.msra.mxu0 %v3536_v10  ;;  %v3203_v11 = vld [vmem:[%s5044_s7] ss:$0 sm:$0xff]  ;;  %v3204_v13 = vld [vmem:[%s5044_s7 + $0x1] ss:$0 sm:$0xff] }
 0x122   : > { %v826_v6 = vmin.f32 %v824_v1, 10.0  ;;  %v3205_v21 = vld [vmem:[%s5044_s7 + $0x2] ss:$0 sm:$0xff]  ;;  %v3208_v45 = vld [vmem:[%s5044_s7 + $0x3] ss:$0 sm:$0xff] }
 0x123   : > { %830 = vperm.xlu0 %3749, %v825_v3   ;;  %v3209_v47 = vld [vmem:[%s5044_s7 + $0x4] ss:$0 sm:$0xff] }
 0x127   : > { %835 = vperm.xlu0 %3749, %v826_v6  }
 0x1a2   : > { %v831_v12 = vpop.permute.xlu0 %830 }
 0x1a3   : > { %v842_v14 = vmul.f32 %v3203_v11, %v831_v12 }
 0x1a5   : > { %v849_v15 = vadd.f32 %v3204_v13, %v842_v14 }
 0x1a6   : > { %v836_v16 = vpop.permute.xlu0 %835 }
 0x1a7   : > { %v843_v17 = vmul.f32 %v3203_v11, %v836_v16  ;;  %v851_v18 = vmax.f32 %v849_v15, 0.0 }
 0x1a9   : > { %v850_v19 = vadd.f32 %v3204_v13, %v843_v17  ;;  %3376 = vmatprep.mubr.msk.f32.mxu0 %vm862_vm0, %v851_v18 }
 0x1ab   : > { %v852_v20 = vmax.f32 %v850_v19, 0.0 }
 0x1ad   : > { %3377 = vmatmul.mubr.msk.f32.vlgmr.msra.gmra.mrb[0].mxu0 %vm862_vm0, %v852_v20 }
 0x280   : > { %v3378_v22 = vpop.f32.mrb[0].mxu0 }
 0x281   : > { %v935_v23 = vpop.f32.mrb[1].mxu0  ;;  %v941_v25 = vadd.f32 %v3378_v22, %v3205_v21 }
 0x282   : > { %v936_v24 = vadd.f32 %v3205_v21, %v935_v23 }
 0x283   : > { %v949_v27 = vsel %vm862_vm0, %v941_v25, 0.0 }
 0x284   : > { %v946_v26 = vsel %vm862_vm0, %v936_v24, 0.0 }
 0x285   : > { %947 = vadd.xlane.f32.xlu1 %v946_v26 }
 0x289   : > { %950 = vadd.xlane.f32.xlu1 %v949_v27 }
 0x312   : > { %v948_v28 = vpop.xlane.xlu1 %947 }
 0x313   : > { %v953_v29 = vmul.f32 0.03125, %v948_v28 }
 0x315   : > { %v955_v30 = vsub.f32 %v936_v24, %v953_v29 }
 0x316   : > { %v951_v31 = vpop.xlane.xlu1 %950 }
 0x317   : > { %v954_v32 = vmul.f32 0.03125, %v951_v31  ;;  %v957_v33 = vmul.f32 %v955_v30, %v955_v30 }
 0x319   : > { %v956_v34 = vsub.f32 %v941_v25, %v954_v32  ;;  %v959_v35 = vsel %vm862_vm0, %v957_v33, 0.0 }
 0x31a   : > { %960 = vadd.xlane.f32.xlu0 %v959_v35 }
 0x31b   : > { %v958_v36 = vmul.f32 %v956_v34, %v956_v34 }
 0x31d   : > { %v962_v37 = vsel %vm862_vm0, %v958_v36, 0.0 }
 0x31e   : > { %963 = vadd.xlane.f32.xlu1 %v962_v37 }
 0x3a7   : > { %v961_v38 = vpop.xlane.xlu0 %960 }
 0x3a8   : > { %v965_v39 = vmul.f32 0.03125, %v961_v38 }
 0x3aa   : > { %v967_v40 = vadd.f32 1e-05, %v965_v39 }
 0x3ab   : > { %v964_v41 = vpop.xlane.xlu1 %963 }
 0x3ac   : > { %3750 = vrsqrt.f32 %v967_v40  ;;  %v966_v42 = vmul.f32 0.03125, %v964_v41 }
 0x3ae   : > { %v968_v43 = vadd.f32 1e-05, %v966_v42 }
 0x3b0   : > { %3752 = vrsqrt.f32 %v968_v43 }
 0x3b6   : > { %v3751_v44 = vpop.eup %3750 }
 0x3b7   : > { %v971_v46 = vmul.f32 %v3751_v44, %v955_v30 }
 0x3b9   : > { %v977_v48 = vmul.f32 %v3208_v45, %v971_v46 }
 0x3ba   : > { %v3753_v49 = vpop.eup %3752 }
 0x3bb   : > { %v983_v50 = vadd.f32 %v3209_v47, %v977_v48  ;;  %v972_v51 = vmul.f32 %v3753_v49, %v956_v34 }
 0x3bd   : > { %985 = vst.msk [vmem:[#allocation2] sm:$0xff] %vm862_vm0, %v983_v50  ;;  %v978_v52 = vmul.f32 %v3208_v45, %v972_v51 }
 0x3bf   : > { %v984_v53 = vadd.f32 %v3209_v47, %v978_v52 }
 0x3c1   : > { %986 = vst.msk [vmem:[#allocation2 + $0x8] sm:$0xff] %vm862_vm0, %v984_v53 }
 0x3c2 PF: > { %v3210_v54 = vld [vmem:[%s4623_s3 + $0x20] sm:$0xff]  ;;  %v3211_v55 = vld [vmem:[%s4623_s3 + $0x28] sm:$0xff]  ;;  %v4171_v57 = vmov 0.0|0.0   ;;  %v3212_v60 = vld [vmem:[%s4623_s3 + $0x30] sm:$0xff]  ;;  %vm4172_vm1 = vmmov 0   ;;  %v4173_v1 = vmov 0.0  }
 0x3c3   : > { %v990_v56 = vld [vmem:[%s4623_s3] sm:$0xff]  ;;  %3540 = vmatprep.subr.bf16.mxu0 %v4171_v57  ;;  %3546 = vmatprep.subr.bf16.mxu1 %v4171_v57  ;;  %v3541_v58 = vpack.c.bf16 %v3211_v55, %v3210_v54  ;;  %v991_v59 = vld [vmem:[%s4623_s3 + $0x8] sm:$0xff]  ;;  %v3213_v61 = vld [vmem:[%s4623_s3 + $0x38] sm:$0xff]  ;;  %vm1001_vm2 = vcmask 261120   ;;  %vm1408_vm3 = vcmask 64512   ;;  %vm1494_vm5 = vcmask 130048  }
 0x3c4   : > { %v3547_v62 = vpack.c.bf16 %v991_v59, %v990_v56  ;;  %v992_v63 = vld [vmem:[%s4623_s3 + $0x10] sm:$0xff]  ;;  %v993_v0 = vld [vmem:[%s4623_s3 + $0x18] sm:$0xff]  ;;  %3398 = vmatprep.mubr.msk.f32.mxu1 %vm4172_vm1, %v4173_v1  ;;  %3387 = vmatprep.mubr.msk.f32.mxu0 %vm4172_vm1, %v4173_v1  ;;  %v3544_v2 = vpack.c.bf16 %v3213_v61, %v3212_v60  ;;  %v3216_v6 = vld [vmem:[%s4623_s3 + $0x40] sm:$0xff]  ;;  %s4175_s30 = smov 64   ;;  %s4176_s19 = smov 88   ;;  %vm1235_vm6 = vcmask 260096  }
 0x3c5   : > { %3542 = vmatpush3.bf16.msra.mxu0 %v3541_v58  ;;  %v1306_v3 = vld [vmem:[%s4672_s26] sm:$0xff]  ;;  %v1307_v4 = vld [vmem:[%s4672_s26 + $0x8] sm:$0xff]  ;;  %v3550_v5 = vpack.c.bf16 %v993_v0, %v992_v63  ;;  %v3217_v7 = vld [vmem:[%s4623_s3 + $0x48] sm:$0xff]  ;;  %s4177_s20 = smov 120   ;;  %s4178_s29 = smov 56   ;;  %vm1271_vm7 = vcmask 259072  }
 0x3c6   : > { %3548 = vmatpush3.bf16.msra.mxu1 %v3547_v62  ;;  %3543 = vmatprep.subr.bf16.mxu0 %v4171_v57  ;;  %v3558_v8 = vpack.c.bf16 %v1307_v4, %v1306_v3  ;;  %v1308_v9 = vld [vmem:[%s4672_s26 + $0x10] sm:$0xff]  ;;  %v1309_v10 = vld [vmem:[%s4672_s26 + $0x18] sm:$0xff]  ;;  %v3553_v12 = vpack.c.bf16 %v3217_v7, %v3216_v6  ;;  %v3218_v14 = vld [vmem:[%s4623_s3 + $0x50] sm:$0xff]  ;;  %s4174_s26 = smov 96   ;;  %s4179_s23 = smov 80   ;;  %vm1283_vm8 = vcmask 253952  }
 0x3c7   : > { %3549 = vmatprep.subr.bf16.mxu1 %v4171_v57  ;;  %v3219_v15 = vld [vmem:[%s4623_s3 + $0x58] sm:$0xff]  ;;  %v3562_v16 = vpack.c.bf16 %v1309_v10, %v1308_v9  ;;  %v4731_v18 = vld [vmem:[#allocation2] sm:$0xff]  ;;  %s5045_s3 = scalar_lea.vmem [#allocation8], %s4620_s0  ;;  %vm4759_vm4 = vmpackc.low %vm1408_vm3, %vm1408_vm3  ;;  %s4180_s14 = smov 112   ;;  %vm1302_vm10 = vcmask 7168   ;;  %vm1304_vm11 = vcmask 8192  }
 0x3c8   : > { %v995_v11 = vld [vmem:[#allocation2 + $0x1] ss:$2 sm:$0x7f]  ;;  %v989_v13 = vld [vmem:[#allocation2] ss:$2 sm:$0x7f]  ;;  %v3556_v17 = vpack.c.bf16 %v3219_v15, %v3218_v14 }
 0x3c9   : > { %3545 = vmatpush3.bf16.msra.mxu0 %v3544_v2  ;;  %v1149_v19 = vld [vmem:[#allocation2 + $0x2] ss:$2 sm:$0x7f]  ;;  %v3224_v26 = vld [vmem:[%s5045_s3] ss:$0 sm:$0xff]  ;;  %s4181_s15 = smov 104  }
 0x3ca   : > { %3551 = vmatpush3.bf16.msra.mxu1 %v3550_v5  ;;  %3552 = vmatprep.subr.bf16.mxu0 %v4171_v57  ;;  %v4737_v20 = vld [vmem:[#allocation2 + $0x8] sm:$0xff]  ;;  %s4182_s17 = smov 72   ;;  %s4183_s8 = smov 48  }
 0x3cb   : > { %3559 = vmatprep.subr.bf16.mxu1 %v3558_v8  ;;  %s4184_s1 = smov 40   ;;  %p3270_p1 = scmp.ne.s32.totalorder %s4439_s16, 2 }
 0x3cc   : > { %3388 = vmatmul.mubr.msk.f32.vlgmr.msra.gmra.mrb[0].mxu0 %vm1001_vm2, %v995_v11  ;;  %vm4187_vm12 = vmmov (!%p3270_p1), 0   ;;  %vm2922_vm13 = vcmask (!%p3270_p1), 40960  }
 0x3cd   : > { %3399 = vmatmul.mubr.msk.f32.vlgmr.msra.gmra.mrb[0].mxu1 %vm1001_vm2, %v989_v13  ;;  %3554 = vmatpush3.bf16.msra.mxu0 %v3553_v12 }
 0x3ce   : > { %3561 = vmatpush3.bf16.msra.mxu1 %v3558_v8  ;;  %3555 = vmatprep.subr.bf16.mxu0 %v4171_v57 }
 0x3cf   : > { %3563 = vmatprep.subr.bf16.mxu1 %v3562_v16  ;;  %3409 = vmatprep.mubr.msk.f32.mxu0 %vm4172_vm1, %v4173_v1 }
 0x3d0   : > { %3420 = vmatprep.mubr.msk.f32.mxu1 %vm1001_vm2, %v4731_v18 }
 0x3d1   : > { %3557 = vmatpush3.bf16.msra.mxu0 %v3556_v17 }
 0x3d2   : > { %3565 = vmatpush3.bf16.msra.mxu1 %v3562_v16 }
 0x3d4   : > { %3410 = vmatmul.mubr.msk.f32.vlgmr.msra.gmra.mrb[2].mxu0 %vm1001_vm2, %v1149_v19 }
 0x3d5   : > { %3421 = vmatmul.mubr.msk.f32.vlgmr.msra.gmra.mrb[2].mxu1 %vm1001_vm2, %v4737_v20 }
 0x49f   : > { %v1071_v21 = vpop.f32.mrb[0].mxu0 }
 0x4a0   : > { %v1144_v22 = vpop.f32.mrb[0].mxu1  ;;  %v3389_v23 = vpop.f32.mrb[1].mxu0 }
 0x4a1   : > { %v1145_v24 = vadd.f32 %v1144_v22, %v1071_v21  ;;  %v3400_v25 = vpop.f32.mrb[1].mxu1 }
 0x4a7   : > { %v1224_v27 = vpop.f32.mrb[2].mxu0 }
 0x4a8   : > { %v4744_v28 = vadd.f32 %v1224_v27, %v1145_v24  ;;  %v3422_v29 = vpop.f32.mrb[2].mxu1  ;;  %v3411_v30 = vpop.f32.mrb[3].mxu0 }
 0x4a9   : > { %v4746_v31 = vadd.f32 %v3422_v29, %v3224_v26  ;;  %v1389_v32 = vpop.f32.mrb[3].mxu1 }
 0x4aa   : > { %v4748_v33 = vadd.f32 %v3224_v26, %v1389_v32 }
 0x4ac   : > { %3427 = vmatprep.mubr.msk.f32.mxu0 %vm1408_vm3, %v4748_v33  ;;  %v4754_v34 = vpack.i.bf16 %v4746_v31, %v4748_v33 }
 0x4ae   : > { %3755 = vrot.lane.b32.xlu0 %v4754_v34, %s4174_s26 }
 0x520   : > { %v3756_v35 = vpop.permute.xlu0 %3755 }
 0x521   : > { %v3758_v36 = vunpack.i.h.bf16 %v3756_v35  ;;  %v3757_v37 = vunpack.i.l.bf16 %v3756_v35 }
 0x523   : > { %v3566_v39 = vpack.c.bf16 %v3758_v36, %v3757_v37 }
 0x525   : > { %3568 = vmatprep.subr.msk.bf16.mxu0 %vm4759_vm4, %v3566_v39 }
 0x526   : > { %3571 = vmatpush3.bf16.xpose.msk.msra.mxu0 %vm4759_vm4, %v3566_v39 }
 0x52d   : > { %3428 = vmatmul.mubr.msk.f32.vlgmr.msra.gmra.mrb[4].mxu0 %vm1408_vm3, %v4746_v31 }
 0x600   : > { %v3429_v40 = vpop.f32.mrb[4].mxu0 }
 0x601   : > { %v1493_v41 = vmul.f32 0.35355338, %v3429_v40  ;;  %v1483_v42 = vpop.f32.mrb[5].mxu0 }
 0x602   : > { %v1492_v43 = vmul.f32 0.35355338, %v1483_v42 }
 0x603   : > { %v1498_v44 = vsel %vm1494_vm5, %v1493_v41, -inf }
 0x604   : > { %1499 = vmax.xlane.f32.xlu1 %v1498_v44  ;;  %v1495_v45 = vsel %vm1494_vm5, %v1492_v43, -inf }
 0x605   : > { %1496 = vmax.xlane.f32.xlu0 %v1495_v45 }
 0x615   : > { %3760 = vrot.lane.b32.xlu1 %v4754_v34, %s4175_s30 }
 0x619   : > { %3765 = vrot.lane.b32.xlu1 %v4754_v34, %s4176_s19 }
 0x61b   : > { %1606 = vrot.lane.b32.xlu0 %v4746_v31, %s4177_s20 }
 0x691   : > { %v1500_v46 = vpop.xlane.xlu1 %1499 }
 0x692   : > { %v1502_v47 = vsub.f32 %v1493_v41, %v1500_v46  ;;  %v1497_v48 = vpop.xlane.xlu0 %1496 }
 0x693   : > { %v1501_v49 = vsub.f32 %v1492_v43, %v1497_v48 }
 0x694   : > { %v1505_v50 = vmul.f32 1.442695, %v1502_v47 }
 0x695   : > { %v1503_v51 = vmul.f32 1.442695, %v1501_v49  ;;  %v3761_v52 = vpop.permute.xlu1 %3760 }
 0x696   : > { %3794 = vpow2.f32 %v1505_v50  ;;  %v3763_v53 = vunpack.i.h.bf16 %v3761_v52  ;;  %v3762_v54 = vunpack.i.l.bf16 %v3761_v52  ;;  %v1607_v8 = vpop.permute.xlu0 %1606 }
 0x697   : > { %3796 = vpow2.f32 %v1503_v51 }
 0x698   : > { %v3572_v55 = vpack.c.bf16 %v3763_v53, %v3762_v54  ;;  %v1399_v54 = vld [vmem:[%s4631_s21 + $0x8] sm:$0xff] }
 0x699   : > { %v3766_v56 = vpop.permute.xlu1 %3765  ;;  %3451 = vmatprep.subr.mxu0 %v1399_v54 }
 0x69a   : > { %v3768_v57 = vunpack.i.h.bf16 %v3766_v56  ;;  %v3767_v58 = vunpack.i.l.bf16 %v3766_v56  ;;  %3573 = vmatprep.subr.bf16.mxu1 %v3572_v55  ;;  %3452 = vmatpush3.msra.mxu0 %v1399_v54 }
 0x69b   : > { %3575 = vmatpush3.bf16.msra.mxu1 %v3572_v55  ;;  %v1398_v55 = vld [vmem:[%s4631_s21] sm:$0xff] }
 0x69c   : > { %v3576_v59 = vpack.c.bf16 %v3768_v57, %v3767_v58  ;;  %3456 = vmatprep.subr.mxu0 %v1398_v55 }
 0x69e   : > { %3578 = vmatprep.subr.msk.bf16.mxu1 %vm4759_vm4, %v3576_v59 }
 0x6a0   : > { %v3795_v60 = vpop.eup %3794 }
 0x6a1   : > { %v1510_v61 = vsel %vm1494_vm5, %v3795_v60, 0.0  ;;  %v3797_v62 = vpop.eup %3796 }
 0x6a2   : > { %1511 = vadd.xlane.f32.xlu1 %v1510_v61  ;;  %v1507_v63 = vsel %vm1494_vm5, %v3797_v62, 0.0 }
 0x6a6   : > { %1508 = vadd.xlane.f32.xlu1 %v1507_v63 }
 0x6b7   : > { %1604 = vrot.lane.b32.xlu1 %v4748_v33, %s4177_s20 }
 0x72f   : > { %v1512_v0 = vpop.xlane.xlu1 %1511 }
 0x730   : > { %3798 = vrcp.f32 %v1512_v0 }
 0x733   : > { %v1509_v2 = vpop.xlane.xlu1 %1508 }
 0x734   : > { %3800 = vrcp.f32 %v1509_v2 }
 0x737   : > { %v1605_v7 = vpop.permute.xlu1 %1604 }
 0x73a   : > { %v3799_v3 = vpop.eup %3798 }
 0x73b   : > { %v1516_v6 = vmul.f32 %v3799_v3, %v3795_v60 }
 0x73e   : > { %v3801_v4 = vpop.eup %3800 }
 0x73f   : > { %v1515_v5 = vmul.f32 %v3801_v4, %v3797_v62 }
 0x741   : > { %3434 = vmatprep.mubr.msk.f32.mxu1 %vm1494_vm5, %v1515_v5 }
 0x742   : > { %3435 = vmatmul.mubr.msk.f32.vlgmr.msra.gmra.mrb[4].mxu1 %vm1494_vm5, %v1516_v6 }
 0x743   : > { %3581 = vmatpush3.bf16.xpose.msk.msra.mxu1 %vm4759_vm4, %v3576_v59  ;;  %3441 = vmatprep.mubr.msk.f32.mxu1 %vm1408_vm3, %v1605_v7 }
 0x74a   : > { %3442 = vmatmul.mubr.msk.f32.vlgmr.msra.gmra.mrb[6].mxu1 %vm1408_vm3, %v1607_v8 }
 0x815   : > { %v4785_v9 = vpop.f32.mrb[4].mxu1 }
 0x816   : > { %v4787_v10 = vpop.f32.mrb[5].mxu1 }
 0x81d   : > { %v3443_v11 = vpop.f32.mrb[6].mxu1 }
 0x81e   : > { %v1696_v12 = vmul.f32 0.35355338, %v3443_v11  ;;  %v1686_v13 = vpop.f32.mrb[7].mxu1 }
 0x81f   : > { %v1695_v14 = vmul.f32 0.35355338, %v1686_v13 }
 0x820   : > { %v1700_v15 = vsel %vm1494_vm5, %v1696_v12, -inf }
 0x821   : > { %1701 = vmax.xlane.f32.xlu0 %v1700_v15  ;;  %v1697_v16 = vsel %vm1494_vm5, %v1695_v14, -inf }
 0x822   : > { %1698 = vmax.xlane.f32.xlu1 %v1697_v16 }
 0x833   : > { %3770 = vrot.lane.b32.xlu1 %v4754_v34, %s4178_s29 }
 0x837   : > { %3775 = vrot.lane.b32.xlu0 %v4754_v34, %s4179_s23  ;;  %1968 = vrot.lane.b32.xlu1 %v4748_v33, %s4180_s14 }
 0x83b   : > { %2253 = vrot.lane.b32.xlu0 %v4748_v33, %s4181_s15 }
 0x8ae   : > { %v1702_v17 = vpop.xlane.xlu0 %1701 }
 0x8af   : > { %v1704_v19 = vsub.f32 %v1696_v12, %v1702_v17  ;;  %v1699_v21 = vpop.xlane.xlu1 %1698 }
 0x8b0   : > { %v1703_v22 = vsub.f32 %v1695_v14, %v1699_v21  ;;  %v1400_v21 = vld [vmem:[%s4631_s21 + $0x10] sm:$0xff] }
 0x8b1   : > { %v1707_v23 = vmul.f32 1.442695, %v1704_v19 }
 0x8b2   : > { %v1705_v24 = vmul.f32 1.442695, %v1703_v22  ;;  %v3776_v25 = vpop.permute.xlu0 %3775 }
 0x8b3   : > { %3802 = vpow2.f32 %v1707_v23  ;;  %v3771_v26 = vpop.permute.xlu1 %3770  ;;  %v3778_v27 = vunpack.i.h.bf16 %v3776_v25  ;;  %v3777_v29 = vunpack.i.l.bf16 %v3776_v25 }
 0x8b4   : > { %v3773_v30 = vunpack.i.h.bf16 %v3771_v26  ;;  %v3772_v32 = vunpack.i.l.bf16 %v3771_v26  ;;  %3804 = vpow2.f32 %v1705_v24 }
 0x8b5   : > { %v3586_v36 = vpack.c.bf16 %v3778_v27, %v3777_v29 }
 0x8b6   : > { %v3582_v35 = vpack.c.bf16 %v3773_v30, %v3772_v32 }
 0x8b7   : > { %v1969_v41 = vpop.permute.xlu1 %1968 }
 0x8b8   : > { %3583 = vmatprep.subr.bf16.mxu1 %v3582_v35 }
 0x8b9   : > { %3585 = vmatpush3.bf16.msra.mxu1 %v3582_v35 }
 0x8ba   : > { %3588 = vmatprep.subr.msk.bf16.mxu1 %vm4759_vm4, %v3586_v36 }
 0x8bd   : > { %v3803_v33 = vpop.eup %3802 }
 0x8be   : > { %v1712_v37 = vsel %vm1494_vm5, %v3803_v33, 0.0  ;;  %v3805_v39 = vpop.eup %3804 }
 0x8bf   : > { %1713 = vadd.xlane.f32.xlu1 %v1712_v37  ;;  %v1709_v40 = vsel %vm1494_vm5, %v3805_v39, 0.0 }
 0x8c3   : > { %1710 = vadd.xlane.f32.xlu1 %v1709_v40 }
 0x8d4   : > { %1970 = vrot.lane.b32.xlu1 %v4746_v31, %s4180_s14 }
 0x8d8   : > { %3780 = vrot.lane.b32.xlu1 %v4754_v34, %s4182_s17 }
 0x8dc   : > { %2255 = vrot.lane.b32.xlu1 %v4746_v31, %s4181_s15  ;;  %v2254_v31 = vpop.permute.xlu0 %2253 }
 0x94c   : > { %v1714_v42 = vpop.xlane.xlu1 %1713 }
 0x94d   : > { %3806 = vrcp.f32 %v1714_v42 }
 0x950   : > { %v1711_v43 = vpop.xlane.xlu1 %1710 }
 0x951   : > { %3808 = vrcp.f32 %v1711_v43 }
 0x954   : > { %v1971_v44 = vpop.permute.xlu1 %1970 }
 0x957   : > { %v3807_v46 = vpop.eup %3806 }
 0x958   : > { %v3781_v45 = vpop.permute.xlu1 %3780  ;;  %v1718_v51 = vmul.f32 %v3807_v46, %v3803_v33 }
 0x959   : > { %v3783_v48 = vunpack.i.h.bf16 %v3781_v45  ;;  %v3782_v49 = vunpack.i.l.bf16 %v3781_v45 }
 0x95b   : > { %v3809_v47 = vpop.eup %3808  ;;  %v3596_v52 = vpack.c.bf16 %v3783_v48, %v3782_v49 }
 0x95c   : > { %v1717_v50 = vmul.f32 %v3809_v47, %v3805_v39  ;;  %v2256_v53 = vpop.permute.xlu1 %2255 }
 0x95e   : > { %3448 = vmatprep.mubr.msk.f32.mxu1 %vm1494_vm5, %v1717_v50 }
 0x95f   : > { %3449 = vmatmul.mubr.msk.f32.vlgmr.msra.gmra.mrb[8].mxu1 %vm1494_vm5, %v1718_v51 }
 0x960   : > { %3591 = vmatpush3.bf16.xpose.msk.msra.mxu1 %vm4759_vm4, %v3586_v36  ;;  %3465 = vmatprep.mubr.msk.f32.mxu1 %vm1408_vm3, %v1969_v41 }
 0x961   : > { %3598 = vmatprep.subr.msk.bf16.mxu1 %vm4759_vm4, %v3596_v52 }
 0x967   : > { %3466 = vmatmul.mubr.msk.f32.vlgmr.msra.gmra.mrb[10].mxu1 %vm1408_vm3, %v1971_v44 }
 0x968   : > { %3601 = vmatpush3.bf16.xpose.msk.msra.mxu1 %vm4759_vm4, %v3596_v52  ;;  %3484 = vmatprep.mubr.msk.f32.mxu1 %vm1408_vm3, %v2254_v31  ;;  %v1401_v31 = vld [vmem:[%s4631_s21 + $0x18] sm:$0xff]  ;;  %s5048_s21 = scalar_lea.vmem [#allocation12], %s4620_s0 }
 0x96f   : > { %3485 = vmatmul.mubr.msk.f32.vlgmr.msra.gmra.mrb[12].mxu1 %vm1408_vm3, %v2256_v53 }
 0xa32   : > { %v3450_v56 = vpop.f32.mrb[8].mxu1 }
 0xa33   : > { %v1797_v57 = vpop.f32.mrb[9].mxu1 }
 0xa34   : > { %3453 = vmatprep.mubr.msk.f32.mxu0 %vm1408_vm3, %v1797_v57 }
 0xa35   : > { %3454 = vmatmul.mubr.msk.f32.vlgmr.msra.gmra.mrb[6].mxu0 %vm1408_vm3, %v3450_v56  ;;  %v3259_v56 = vld [vmem:[%s4648_s24] ss:$0 sm:$0xff] }
 0xa36   : > { %3458 = vmatprep.mubr.msk.f32.mxu0 %vm1408_vm3, %v4787_v10  ;;  %3457 = vmatpush3.msra.mxu0 %v1398_v55 }
 0xa3a   : > { %v3467_v38 = vpop.f32.mrb[10].mxu1 }
 0xa3b   : > { %v2060_v58 = vmul.f32 0.35355338, %v3467_v38  ;;  %v2050_v59 = vpop.f32.mrb[11].mxu1 }
 0xa3c   : > { %v2059_v60 = vmul.f32 0.35355338, %v2050_v59 }
 0xa3d   : > { %v2064_v61 = vsel %vm1494_vm5, %v2060_v58, -inf  ;;  %3459 = vmatmul.mubr.msk.f32.vlgmr.msra.gmra.mrb[6].mxu0 %vm1408_vm3, %v4785_v9 }
 0xa3e   : > { %2065 = vmax.xlane.f32.xlu1 %v2064_v61  ;;  %v2061_v62 = vsel %vm1494_vm5, %v2059_v60, -inf }
 0xa3f   : > { %2062 = vmax.xlane.f32.xlu0 %v2061_v62 }
 0xa42   : > { %v3486_v63 = vpop.f32.mrb[12].mxu1 }
 0xa43   : > { %v2335_v0 = vpop.f32.mrb[13].mxu1  ;;  %v2345_v16 = vmul.f32 0.35355338, %v3486_v63 }
 0xa45   : > { %v2349_v19 = vsel %vm1494_vm5, %v2345_v16, -inf }
 0xa4f   : > { %3785 = vrot.lane.b32.xlu1 %v4754_v34, %s4183_s8  ;;  %s5052_s8 = sld [smem:[#allocation37_spill]] (!%p3270_p1) }
 0xa53   : > { %3790 = vrot.lane.b32.xlu1 %v4754_v34, %s4184_s1  ;;  %v2344_v34 = vmul.f32 0.35355338, %v2335_v0 }
 0xa55   : > { %v2346_v17 = vsel %vm1494_vm5, %v2344_v34, -inf }
 0xacb   : > { %v2066_v2 = vpop.xlane.xlu1 %2065 }
 0xacc   : > { %v2068_v3 = vsub.f32 %v2060_v58, %v2066_v2  ;;  %v2063_v4 = vpop.xlane.xlu0 %2062 }
 0xacd   : > { %v2067_v5 = vsub.f32 %v2059_v60, %v2063_v4 }
 0xace   : > { %v2071_v6 = vmul.f32 1.442695, %v2068_v3 }
 0xacf   : > { %v2069_v7 = vmul.f32 1.442695, %v2067_v5  ;;  %v3786_v8 = vpop.permute.xlu1 %3785 }
 0xad0   : > { %v3788_v9 = vunpack.i.h.bf16 %v3786_v8  ;;  %v3787_v10 = vunpack.i.l.bf16 %v3786_v8 }
 0xad1   : > { %3810 = vpow2.f32 %v2069_v7 }
 0xad2   : > { %v3592_v11 = vpack.c.bf16 %v3788_v9, %v3787_v10  ;;  %3812 = vpow2.f32 %v2071_v6 }
 0xad3   : > { %v3791_v27 = vpop.permute.xlu1 %3790 }
 0xad4   : > { %3593 = vmatprep.subr.bf16.mxu0 %v3592_v11  ;;  %v3793_v36 = vunpack.i.h.bf16 %v3791_v27  ;;  %v3792_v33 = vunpack.i.l.bf16 %v3791_v27 }
 0xad5   : > { %3595 = vmatpush3.bf16.msra.mxu0 %v3592_v11  ;;  %v2588_v11 = vld [vmem:[%s4637_s18] sm:$0xff] }
 0xad6   : > { %3475 = vmatprep.subr.mxu0 %v1400_v21  ;;  %v3602_v41 = vpack.c.bf16 %v3793_v36, %v3792_v33 }
 0xadb   : > { %v3811_v12 = vpop.eup %3810 }
 0xadc   : > { %v2073_v13 = vsel %vm1494_vm5, %v3811_v12, 0.0  ;;  %v3813_v14 = vpop.eup %3812 }
 0xadd   : > { %2074 = vadd.xlane.f32.xlu0 %v2073_v13  ;;  %v2076_v15 = vsel %vm1494_vm5, %v3813_v14, 0.0 }
 0xae1   : > { %2077 = vadd.xlane.f32.xlu0 %v2076_v15 }
 0xae5   : > { %2347 = vmax.xlane.f32.xlu0 %v2346_v17  ;;  %v2683_v17 = vld [vmem:[%s4645_s25 + $0x8] sm:$0xff] }
 0xae9   : > { %2350 = vmax.xlane.f32.xlu0 %v2349_v19 }
 0xb6a   : > { %v2075_v22 = vpop.xlane.xlu0 %2074 }
 0xb6b   : > { %3814 = vrcp.f32 %v2075_v22 }
 0xb6e   : > { %v2078_v23 = vpop.xlane.xlu0 %2077 }
 0xb6f   : > { %3816 = vrcp.f32 %v2078_v23 }
 0xb72   : > { %v2348_v24 = vpop.xlane.xlu0 %2347 }
 0xb73   : > { %v2352_v25 = vsub.f32 %v2344_v34, %v2348_v24  ;;  %v2591_v34 = vld [vmem:[%s4637_s18 + $0x18] sm:$0xff] }
 0xb75   : > { %v3815_v26 = vpop.eup %3814  ;;  %v2354_v29 = vmul.f32 1.442695, %v2352_v25 }
 0xb76   : > { %v2351_v30 = vpop.xlane.xlu0 %2350  ;;  %v2081_v32 = vmul.f32 %v3815_v26, %v3811_v12  ;;  %v2589_v12 = vld [vmem:[%s4637_s18 + $0x8] sm:$0xff] }
 0xb77   : > { %3818 = vpow2.f32 %v2354_v29  ;;  %v2353_v35 = vsub.f32 %v2345_v16, %v2351_v30  ;;  %v3606_v13 = vpack.c.bf16 %v2589_v12, %v2588_v11  ;;  %v2682_v16 = vld [vmem:[%s4645_s25] sm:$0xff] }
 0xb78   : > { %3472 = vmatprep.mubr.msk.f32.mxu0 %vm1494_vm5, %v2081_v32  ;;  %v3614_v19 = vpack.c.bf16 %v2683_v17, %v2682_v16  ;;  %v3260_v29 = vld [vmem:[%s4648_s24 + $0x1] ss:$0 sm:$0xff]  ;;  %v3261_v32 = vld [vmem:[%s4648_s24 + $0x2] ss:$0 sm:$0xff] }
 0xb79   : > { %v3817_v37 = vpop.eup %3816  ;;  %v2356_v39 = vmul.f32 1.442695, %v2353_v35  ;;  %3607 = vmatprep.subr.bf16.mxu1 %v3606_v13 }
 0xb7a   : > { %v2082_v40 = vmul.f32 %v3817_v37, %v3813_v14  ;;  %3609 = vmatpush3.bf16.msra.mxu1 %v3606_v13  ;;  %v2590_v14 = vld [vmem:[%s4637_s18 + $0x10] sm:$0xff] }
 0xb7b   : > { %3820 = vpow2.f32 %v2356_v39  ;;  %v3610_v15 = vpack.c.bf16 %v2591_v34, %v2590_v14  ;;  %v3222_v14 = vld [vmem:[%s4666_s6 + $0x2] ss:$0 sm:$0xff] }
 0xb7c   : > { %3473 = vmatmul.mubr.msk.f32.vlgmr.msra.gmra.mrb[8].mxu0 %vm1494_vm5, %v2082_v40 }
 0xb7d   : > { %3476 = vmatpush3.msra.mxu0 %v1400_v21  ;;  %3611 = vmatprep.subr.bf16.mxu1 %v3610_v15 }
 0xb7e   : > { %3603 = vmatprep.subr.bf16.mxu0 %v3602_v41  ;;  %3613 = vmatpush3.bf16.msra.mxu1 %v3610_v15 }
 0xb81   : > { %v3819_v42 = vpop.eup %3818 }
 0xb82   : > { %v2358_v43 = vsel %vm1494_vm5, %v3819_v42, 0.0 }
 0xb83   : > { %2359 = vadd.xlane.f32.xlu0 %v2358_v43 }
 0xb85   : > { %v3821_v44 = vpop.eup %3820 }
 0xb86   : > { %v2361_v45 = vsel %vm1494_vm5, %v3821_v44, 0.0 }
 0xb87   : > { %2362 = vadd.xlane.f32.xlu0 %v2361_v45 }
 0xc10   : > { %v2360_v46 = vpop.xlane.xlu0 %2359 }
 0xc11   : > { %3822 = vrcp.f32 %v2360_v46 }
 0xc14   : > { %v2363_v47 = vpop.xlane.xlu0 %2362 }
 0xc15   : > { %3824 = vrcp.f32 %v2363_v47 }
 0xc1b   : > { %v3823_v48 = vpop.eup %3822 }
 0xc1c   : > { %v2366_v52 = vmul.f32 %v3823_v48, %v3819_v42  ;;  %v2685_v42 = vld [vmem:[%s4645_s25 + $0x18] sm:$0xff] }
 0xc1f   : > { %v3825_v51 = vpop.eup %3824 }
 0xc20   : > { %v2367_v53 = vmul.f32 %v3825_v51, %v3821_v44  ;;  %v3262_v44 = vld [vmem:[%s5048_s21] ss:$0 sm:$0xff] }
 0xc21   : > { %v3221_v51 = vld [vmem:[%s4666_s6] ss:$0 sm:$0xff] }
 0xc4f   : > { %v3474_v49 = vpop.f32.mrb[8].mxu0 }
 0xc50   : > { %v2161_v50 = vpop.f32.mrb[9].mxu0 }
 0xc51   : > { %3477 = vmatprep.mubr.msk.f32.mxu0 %vm1408_vm3, %v2161_v50 }
 0xc52   : > { %3478 = vmatmul.mubr.msk.f32.vlgmr.msra.gmra.mrb[6].mxu0 %vm1408_vm3, %v3474_v49 }
 0xc53   : > { %3605 = vmatpush3.bf16.msra.mxu0 %v3602_v41  ;;  %3491 = vmatprep.mubr.msk.f32.mxu0 %vm1494_vm5, %v2366_v52  ;;  %v2684_v41 = vld [vmem:[%s4645_s25 + $0x10] sm:$0xff]  ;;  %v1234_v52 = vadd.f32 %v3221_v51, %v4744_v28  ;;  %s5049_s25 = scalar_lea.vmem %s4962_s5, %s4656_s4  ;;  %s5051_s4 = sld [smem:[#allocation36_spill]] (!%p3270_p1) }
 0xc54   : > { %3494 = vmatprep.subr.mxu0 %v1401_v31  ;;  %v3618_v43 = vpack.c.bf16 %v2685_v42, %v2684_v41 }
 0xc56   : > { %3492 = vmatmul.mubr.msk.f32.vlgmr.msra.gmra.mrb[10].mxu0 %vm1494_vm5, %v2367_v53 }
 0xc57   : > { %3495 = vmatpush3.msra.mxu0 %v1401_v31  ;;  %v1236_v31 = vsel %vm1235_vm6, %v1234_v52, 0.0 }
 0xc58   : > { %3615 = vmatprep.subr.bf16.mxu0 %v3614_v19  ;;  %v1237_v53 = vrot.slane %v1236_v31, 4 }
 0xd29   : > { %v3493_v54 = vpop.f32.mrb[10].mxu0 }
 0xd2a   : > { %v2446_v55 = vpop.f32.mrb[11].mxu0 }
 0xd2b   : > { %3496 = vmatprep.mubr.msk.f32.mxu0 %vm1408_vm3, %v2446_v55 }
 0xd2c   : > { %3497 = vmatmul.mubr.msk.f32.vlgmr.msra.gmra.mrb[6].mxu0 %vm1408_vm3, %v3493_v54  ;;  %v1238_v54 = vadd.f32 %v1237_v53, %v1236_v31 }
 0xd2d   : > { %3617 = vmatpush3.bf16.msra.mxu0 %v3614_v19 }
 0xd2e   : > { %3619 = vmatprep.subr.bf16.mxu0 %v3618_v43  ;;  %v1239_v55 = vrot.slane %v1238_v54, 2 }
 0xd31   : > { %3621 = vmatpush3.bf16.msra.mxu0 %v3618_v43 }
 0xdff   : > { %v3498_v57 = vpop.f32.mrb[6].mxu0 }
 0xe00   : > { %v2544_v38 = vadd.f32 %v3498_v57, %v3259_v56  ;;  %v2527_v58 = vpop.f32.mrb[7].mxu0 }
 0xe01   : > { %v2543_v59 = vadd.f32 %v3259_v56, %v2527_v58  ;;  %v1240_v56 = vadd.f32 %v1239_v55, %v1238_v54 }
 0xe02   : > { %v2546_v60 = vadd.f32 %v2544_v38, %v4737_v20 }
 0xe03   : > { %v2545_v61 = vadd.f32 %v2543_v59, %v4731_v18  ;;  %v1241_v57 = vrot.slane %v1240_v56, 1 }
 0xe04   : > { %v2552_v62 = vsel %vm1001_vm2, %v2546_v60, 0.0 }
 0xe05   : > { %2553 = vadd.xlane.f32.xlu1 %v2552_v62  ;;  %v2549_v63 = vsel %vm1001_vm2, %v2545_v61, 0.0  ;;  %v1242_v38 = vadd.f32 %v1241_v57, %v1240_v56 }
 0xe06   : > { %2550 = vadd.xlane.f32.xlu0 %v2549_v63 }
 0xe07   : > { %v1244_v58 = vmul.f32 0.14285715, %v1242_v38 }
 0xe09   : > { %v1245_v59 = vsub.f32 %v1234_v52, %v1244_v58 }
 0xe92   : > { %v2554_v0 = vpop.xlane.xlu1 %2553 }
 0xe93   : > { %v2557_v2 = vmul.f32 0.03125, %v2554_v0  ;;  %v2551_v3 = vpop.xlane.xlu0 %2550 }
 0xe94   : > { %v2556_v4 = vmul.f32 0.03125, %v2551_v3 }
 0xe95   : > { %v2559_v5 = vsub.f32 %v2546_v60, %v2557_v2  ;;  %v1246_v60 = vmul.f32 %v1245_v59, %v1245_v59 }
 0xe96   : > { %v2558_v6 = vsub.f32 %v2545_v61, %v2556_v4 }
 0xe97   : > { %v2561_v9 = vmul.f32 %v2559_v5, %v2559_v5  ;;  %v1247_v61 = vsel %vm1235_vm6, %v1246_v60, 0.0 }
 0xe98   : > { %v2560_v7 = vmul.f32 %v2558_v6, %v2558_v6  ;;  %v1248_v62 = vrot.slane %v1247_v61, 4 }
 0xe99   : > { %v2565_v10 = vsel %vm1001_vm2, %v2561_v9, 0.0  ;;  %v1255_v9 = vld [vmem:[%s4666_s6 + $0x1] sm:$0x1] }
 0xe9a   : > { %v2562_v8 = vsel %vm1001_vm2, %v2560_v7, 0.0  ;;  %v1249_v63 = vadd.f32 %v1248_v62, %v1247_v61 }
 0xe9b   : > { %2563 = vadd.xlane.f32.xlu0 %v2562_v8 }
 0xe9c   : > { %v1250_v0 = vrot.slane %v1249_v63, 2 }
 0xe9e   : > { %v1251_v2 = vadd.f32 %v1250_v0, %v1249_v63 }
 0xe9f   : > { %2566 = vadd.xlane.f32.xlu0 %v2565_v10 }
 0xea0   : > { %v1252_v3 = vrot.slane %v1251_v2, 1 }
 0xea2   : > { %v1253_v28 = vadd.f32 %v1252_v3, %v1251_v2 }
 0xea4   : > { %v1254_v4 = vmul.f32 0.14285715, %v1253_v28 }
 0xf28   : > { %v2564_v21 = vpop.xlane.xlu0 %2563 }
 0xf29   : > { %v2568_v22 = vmul.f32 0.03125, %v2564_v21 }
 0xf2b   : > { %v2570_v23 = vadd.f32 1e-05, %v2568_v22 }
 0xf2c   : > { %v2567_v24 = vpop.xlane.xlu0 %2566 }
 0xf2d   : > { %3826 = vrsqrt.f32 %v2570_v23  ;;  %v2569_v25 = vmul.f32 0.03125, %v2567_v24  ;;  %v3265_v24 = vld [vmem:[%s4648_s24 + $0x3] ss:$0 sm:$0xff] }
 0xf2f   : > { %v2571_v26 = vadd.f32 1e-05, %v2569_v25 }
 0xf31   : > { %3828 = vrsqrt.f32 %v2571_v26 }
 0xf37   : > { %v3827_v27 = vpop.eup %3826 }
 0xf38   : > { %v2574_v30 = vmul.f32 %v3827_v27, %v2558_v6  ;;  %v1259_v6 = vlaneseq }
 0xf3a   : > { %v2580_v35 = vmul.f32 %v3260_v29, %v2574_v30  ;;  %v1260_v7 = vshrl.u32 %v1259_v6, 7  ;;  %v3269_v6 = vld [vmem:[%s4648_s24 + $0x5] ss:$0 sm:$0xff] }
 0xf3b   : > { %v3829_v36 = vpop.eup %3828 }
 0xf3c   : > { %v2575_v33 = vmul.f32 %v3829_v36, %v2559_v5  ;;  %v4859_v37 = vadd.f32 %v3261_v32, %v2580_v35  ;;  %v1256_v5 = vadd.f32 1e-05, %v1254_v4  ;;  %v1261_v11 = vsub.s32 0, %v1260_v7  ;;  %v3268_v4 = vld [vmem:[%s4648_s24 + $0x4] ss:$0 sm:$0xff] }
 0xf3e   : > { %v2581_v39 = vmul.f32 %v3260_v29, %v2575_v33  ;;  %3507 = vmatprep.mubr.msk.f32.mxu1 %vm1001_vm2, %v4859_v37  ;;  %3830 = vrsqrt.f32 %v1256_v5 }
 0xf40   : > { %v4863_v40 = vadd.f32 %v3261_v32, %v2581_v39  ;;  %v1281_v39 = vld [vmem:[%s4666_s6 + $0x3] sm:$0x1]  ;;  %s4185_s6 = smov 1  }
 0xf42   : > { %3508 = vmatmul.mubr.msk.f32.vlgmr.msra.gmra.mrb[14].mxu1 %vm1001_vm2, %v4863_v40 }
 0xf48   : > { %v3831_v8 = vpop.eup %3830 }
 0xf49   : > { %v1258_v10 = vmul.f32 %v3831_v8, %v1255_v9 }
 0xf4b   : > { %v1262_v12 = vrot.slane %v1258_v10, %v1261_v11 }
 0xf4d   : > { %v1263_v13 = vmul.f32 %v1262_v12, %v1245_v59 }
 0xf4f   : > { %v1269_v34 = vadd.f32 %v3222_v14, %v1263_v13 }
 0xf51   : > { %v1270_v15 = vmax.f32 %v1269_v34, 0.0 }
 0xf53   : > { %v1272_v16 = vsel %vm1271_vm7, %v1270_v15, 0.0 }
 0xf54   : > { %v1273_v17 = vrot.slane %v1272_v16, 4 }
 0xf56   : > { %v1274_v19 = vadd.f32 %v1273_v17, %v1272_v16 }
 0xf58   : > { %v1275_v21 = vrot.slane %v1274_v19, 2 }
 0xf5a   : > { %v1276_v22 = vadd.f32 %v1275_v21, %v1274_v19 }
 0xf5c   : > { %v1277_v23 = vrot.slane %v1276_v22, 1 }
 0xf5e   : > { %v1278_v30 = vadd.f32 %v1277_v23, %v1276_v22  ;;  %v2844_v22 = vld [vmem:[%s5051_s4] sm:$0xff] (!%p3270_p1)  ;;  %v4186_v23 = vmov (!%p3270_p1), 0.0|0.0  }
 0xf5f   : > { %3622 = vmatprep.subr.bf16.mxu0 (!%p3270_p1), %v4186_v23 }
 0xf60   : > { %v1280_v33 = vmul.f32 0.16666667, %v1278_v30 }
 0xf62   : > { %v1282_v42 = vmul.f32 %v1281_v39, %v1280_v33 }
 0xf64   : > { %v1284_v43 = vsel %vm1283_vm8, %v1282_v42, 0.0 }
0x1015   : > { %v3509_v45 = vpop.f32.mrb[14].mxu1 }
0x1016   : > { %v2677_v46 = vadd.f32 %v3509_v45, %v3262_v44  ;;  %v2671_v47 = vpop.f32.mrb[15].mxu1 }
0x1017   : > { %v2672_v48 = vadd.f32 %v3262_v44, %v2671_v47 }
0x1018   : > { %v2681_v50 = vmax.f32 %v2677_v46, 0.0 }
0x1019   : > { %v2680_v49 = vmax.f32 %v2672_v48, 0.0 }
0x101b   : > { %3518 = vmatprep.mubr.msk.f32.mxu0 %vm1001_vm2, %v2680_v49 }
0x101c   : > { %3519 = vmatmul.mubr.msk.f32.vlgmr.msra.gmra.mrb[12].mxu0 %vm1001_vm2, %v2681_v50 }
0x10ef   : > { %v3520_v25 = vpop.f32.mrb[12].mxu0 }
0x10f0   : > { %v2763_v26 = vpop.f32.mrb[13].mxu0  ;;  %v2769_v27 = vadd.f32 %v3520_v25, %v3265_v24  ;;  %v2847_v25 = vld [vmem:[%s5051_s4 + $0x18] sm:$0xff] (!%p3270_p1) }
0x10f1   : > { %v2764_v29 = vadd.f32 %v3265_v24, %v2763_v26  ;;  %v4188_v26 = vmov (!%p3270_p1), 0.0  }
0x10f2   : > { %v2773_v36 = vadd.f32 %v2769_v27, %v4863_v40  ;;  %v1287_v40 = vld [vmem:[%s5049_s25] sm:$0x1]  ;;  %3529 = vmatprep.mubr.msk.f32.mxu0 (!%p3270_p1), %vm4187_vm12, %v4188_v26 }
0x10f3   : > { %v2772_v32 = vadd.f32 %v2764_v29, %v4859_v37 }
0x10f4   : > { %v2779_v41 = vsel %vm1001_vm2, %v2773_v36, 0.0 }
0x10f5   : > { %v2776_v35 = vsel %vm1001_vm2, %v2772_v32, 0.0 }
0x10f6   : > { %2777 = vadd.xlane.f32.xlu0 %v2776_v35 }
0x10fa   : > { %2780 = vadd.xlane.f32.xlu0 %v2779_v41 }
0x10fe   : > { %1285 = vadd.xlane.f32.xlu0 %v1284_v43  ;;  %v2848_v43 = vld [vmem:[%s5052_s8] sm:$0x1] (!%p3270_p1) }
0x1183   : > { %v2778_v44 = vpop.xlane.xlu0 %2777 }
0x1184   : > { %v2782_v45 = vmul.f32 0.03125, %v2778_v44 }
0x1186   : > { %v2784_v46 = vsub.f32 %v2772_v32, %v2782_v45 }
0x1187   : > { %v2781_v47 = vpop.xlane.xlu0 %2780 }
0x1188   : > { %v2783_v37 = vmul.f32 0.03125, %v2781_v47  ;;  %v2786_v48 = vmul.f32 %v2784_v46, %v2784_v46 }
0x118a   : > { %v2785_v49 = vsub.f32 %v2773_v36, %v2783_v37  ;;  %v2788_v50 = vsel %vm1001_vm2, %v2786_v48, 0.0 }
0x118b   : > { %2789 = vadd.xlane.f32.xlu0 %v2788_v50  ;;  %v1286_v51 = vpop.xlane.xlu0 %1285 }
0x118c   : > { %v1288_v52 = vadd.f32 %v1287_v40, %v1286_v51  ;;  %v2787_v31 = vmul.f32 %v2785_v49, %v2785_v49 }
0x118e   : > { %v1289_v53 = vsub.f32 0.0, %v1288_v52  ;;  %v2791_v54 = vsel %vm1001_vm2, %v2787_v31, 0.0 }
0x118f   : > { %2792 = vadd.xlane.f32.xlu0 %v2791_v54 }
0x1190   : > { %v1290_v55 = vmul.f32 1.442695, %v1289_v53 }
0x1192   : > { %3832 = vpow2.f32 %v1290_v55 }
0x119c   : > { %v3833_v56 = vpop.eup %3832 }
0x119d   : > { %v1292_v57 = vadd.f32 1.0, %v3833_v56 }
0x119f   : > { %3834 = vrcp.f32 %v1292_v57 }
0x11a9   : > { %v3835_v38 = vpop.eup %3834 }
0x11aa   : > { %1299 = vrot.lane.b32.xlu0 %v3835_v38, %s4185_s6  ;;  %vm1295_vm9 = vcmp.gt.f32.partialorder %v3835_v38, 0.5 }
0x11ab   : > { %v3223_v58 = vsel %vm1295_vm9, 1.0, %v4173_v1 }
0x11ac   : > { %3637 = vpush %v3223_v58  ;;  %v2820_v59 = vsub.f32 1.0, %v3223_v58 }
0x11ae   : > { %3639 = vpush %v2820_v59 }
0x11dd   : > { %s3638_s3 = spop %3637 }
0x11de   : > { %v2816_v12 = vstv %s3638_s3 }
0x11df   : > { %s3640_s26 = spop %3639 }
0x11e0   : > { %v2823_v9 = vstv %s3640_s26 }
0x11e1   : > { %v2825_v13 = vmul.f32 %v2823_v9, %v4731_v18  ;;  %v2826_v17 = vmul.f32 %v2823_v9, %v4737_v20  ;;  %v2845_v18 = vld [vmem:[%s5051_s4 + $0x8] sm:$0xff] (!%p3270_p1)  ;;  %v2846_v20 = vld [vmem:[%s5051_s4 + $0x10] sm:$0xff] (!%p3270_p1) }
0x11e2   : > { %v3623_v24 = vpack.c.bf16 (!%p3270_p1), %v2845_v18, %v2844_v22  ;;  %v3626_v32 = vpack.c.bf16 (!%p3270_p1), %v2847_v25, %v2846_v20 }
0x11e4   : > { %3624 = vmatpush3.bf16.msra.mxu0 (!%p3270_p1), %v3623_v24 }
0x11e5   : > { %3625 = vmatprep.subr.bf16.mxu0 (!%p3270_p1), %v4186_v23 }
0x11e8   : > { %3627 = vmatpush3.bf16.msra.mxu0 (!%p3270_p1), %v3626_v32 }
0x1218   : > { %v2790_v60 = vpop.xlane.xlu0 %2789 }
0x1219   : > { %v2794_v61 = vmul.f32 0.03125, %v2790_v60 }
0x121b   : > { %v2796_v62 = vadd.f32 1e-05, %v2794_v61 }
0x121c   : > { %v2793_v63 = vpop.xlane.xlu0 %2792 }
0x121d   : > { %3836 = vrsqrt.f32 %v2796_v62  ;;  %v2795_v0 = vmul.f32 0.03125, %v2793_v63 }
0x121f   : > { %v2797_v2 = vadd.f32 1e-05, %v2795_v0 }
0x1220   : > { %v1300_v3 = vpop.permute.xlu0 %1299 }
0x1221   : > { %3838 = vrsqrt.f32 %v2797_v2  ;;  %v1303_v28 = vsel %vm1302_vm10, %v3223_v58, %v1300_v3 }
0x1222   : > { %1305 = vst.msk [vmem:[%s818_s13] sm:$0x1] %vm1304_vm11, %v1303_v28 }
0x1227   : > { %v3837_v1 = vpop.eup %3836 }
0x1228   : > { %v2800_v5 = vmul.f32 %v3837_v1, %v2784_v46 }
0x122a   : > { %v2806_v7 = vmul.f32 %v3268_v4, %v2800_v5 }
0x122b   : > { %v3839_v8 = vpop.eup %3838 }
0x122c   : > { %v2812_v10 = vadd.f32 %v3269_v6, %v2806_v7  ;;  %v2801_v11 = vmul.f32 %v3839_v8, %v2785_v49 }
0x122e   : > { %v2818_v14 = vmul.f32 %v2816_v12, %v2812_v10  ;;  %v2807_v34 = vmul.f32 %v3268_v4, %v2801_v11 }
0x1230   : > { %v2827_v15 = vadd.f32 %v2825_v13, %v2818_v14  ;;  %v2813_v16 = vadd.f32 %v3269_v6, %v2807_v34  ;;  %2834 = sbr.rel (%p3270_p1) target bundleno = 4892 (0x131c), region = 120 }
0x1232   : > { %2829 = vst.msk [vmem:[#allocation2] sm:$0xff] %vm1001_vm2, %v2827_v15  ;;  %v2819_v19 = vmul.f32 %v2816_v12, %v2813_v16  ;;  %v2835_v27 = vsel (!%p3270_p1), %vm1001_vm2, %v2827_v15, -inf }
0x1234   : > { %v2828_v21 = vadd.f32 %v2826_v17, %v2819_v19 }
0x1236   : > { %2830 = vst.msk [vmem:[#allocation2 + $0x8] sm:$0xff] %vm1001_vm2, %v2828_v21  ;;  %v2836_v29 = vsel (!%p3270_p1), %vm1001_vm2, %v2828_v21, -inf }
0x1237   : > { %v2837_v30 = vmax.f32 %v2835_v27, %v2836_v29 }
0x1239   : > { %v2838_v35 = vrot.slane %v2837_v30, 4 }
0x123b   : > { %v2839_v36 = vmax.f32 %v2837_v30, %v2838_v35 }
0x123d   : > { %v2840_v33 = vrot.slane %v2839_v36, 2 }
0x123f   : > { %v2841_v39 = vmax.f32 %v2839_v36, %v2840_v33 }
0x1241   : > { %v2842_v41 = vrot.slane %v2841_v39, 1 }
0x1243   : > { %v2843_v42 = vmax.f32 %v2841_v39, %v2842_v41 }
0x1245   : > { %3530 = vmatmul.mubr.msk.f32.vlgmr.msra.gmra.mrb[0].mxu0 %vm1001_vm2, %v2843_v42 }
0x1318   : > { %v2918_v44 = vpop.f32.mrb[0].mxu0 }
0x1319   : > { %v2919_v45 = vadd.f32 %v2918_v44, %v2848_v43  ;;  %v3531_v46 = vpop.f32.mrb[1].mxu0 }
0x131b   : > { %2923 = vst.msk [vmem:[#allocation17] sm:$0x1] %vm2922_vm13, %v2919_v45 }
0x131c PF: > { %p3692_p4 = scmp.eq.s32.totalorder %s4439_s16, 2  ;;  %s4189_s1 = smov [#allocation17]  }
0x131d   : > { %s2934_s21 = sshll.u32 %s4189_s1, 4  ;;  %s2935_s21 = int_to_ptr.vmem [resolvable:$true] %s2934_s21 }
0x131e   : > { %s4078_s0 = scalar_lea.vmem %s2935_s21, 16  ;;  %s4084_s18 = scalar_lea.vmem %s2935_s21, 32 }
0x131f   : > { %p4079_p0 = scmp.ne.s32.totalorder %s2935_s21, %s4078_s0  ;;  %p4085_p13 = scmp.lt.s32.totalorder %s2935_s21, %s2935_s21 }
0x1320   : > { %p4086_p5 = scmp.lt.s32.totalorder %s4084_s18, %s4078_s0 }
0x1321   : > { %p4080_p11 = pnand %p4079_p0, %p3692_p4 }
0x1322   : > { %p4087_p8 = por %p4086_p5, %p4085_p13 }
0x1323   : > { %p4081_p10 = pneg %p4080_p11 }
0x1325   : > { %p4088_p2 = pnand %p4087_p8, %p4081_p10 }
0x1327   : > { %4091 = shalt.err (!%p4088_p2)
}
0x1328   : > { %s5053_s10 = sld [smem:[#allocation38_spill]] }
0x132e   : > { %s4092_s27 = scalar_lea.hbm %s5053_s10, 16 }
0x132f   : > { %p4093_p6 = scmp.ne.s32.totalorder %s5053_s10, %s4092_s27  ;;  %p4098_p3 = scmp.lt.u32.totalorder %s4092_s27, %s5053_s10 }
0x1331   : > { %p4094_p7 = pnand %p4093_p6, %p3692_p4 }
0x1333   : > { %p4095_p9 = pneg %p4094_p7 }
0x1335   : > { %p4100_p12 = pnand %p4098_p3, %p4095_p9 }
0x1337   : > { %4103 = shalt.err (!%p4100_p12)
}
0x1338   : > { %3660 = dma.vmem_to_hbm [thread:$0]  (%p3692_p4), %s2935_s21, 16, %s5053_s10, [#allocation5]  }
0x1339   : > { %4141 = dma.done.wait (%p3692_p4), [#allocation5], 16  }
0x133a   : > { %4143 = vsyncadd (%p3692_p4), [#allocation5], 4294967280 }
0x133b PF: > { %s5054_s24 = sld [smem:[#allocation25_spill]]  ;;  %s5055_s19 = sld [smem:[#allocation24_spill]] }
0x133c   : > { %s5056_s23 = sld [smem:[#allocation26_spill]]  ;;  %s5057_s21 = smov %s4150_s22 }
0x1341   : > { %p38_p1 = scmp.ge.s32.totalorder %s5054_s24, 5   ;;  %s5058_s22 = smov %s5055_s19 }
0x1343   :  { %40 = sbr.rel (!%p38_p1) target bundleno = 25 (0x19), region = 227 }
0x134a   :  { %2956 = vsyncpa [#allocation4], 1 }
0x134b   :  { %2958 = vsyncpa [#allocation4 + $0x1], 1 }
0x134c   :  { %2959 = vsyncpa [#allocation7], 1 }
0x134d   :  { %2961 = vsyncpa [#allocation7 + $0x1], 1 }
0x134e   :  { %2962 = vsyncpa [#allocation10], 1 }
0x134f   :  { %2964 = vsyncpa [#allocation10 + $0x1], 1 }
0x1350   :  { %2965 = vsyncpa [#allocation13], 1 }
0x1351   :  { %2967 = vsyncpa [#allocation13 + $0x1], 1 }
0x1352   :  { %2968 = vsyncpa [#allocation16], 1 }
0x1353   :  { %2970 = vsyncpa [#allocation16 + $0x1], 1 }
0x1354   :  { %2971 = vsyncpa [#allocation5], 1 }
0x1355   :  { %2973 = vsyncpa [#allocation5 + $0x1], 1 }

</bundles_post_ra>
